<compile_context>
chip_gen: v7x
topology: tpu7x:2x2x1
jax: 0.10.0
libtpu: 0.0.40
codegen_flags: <defaults>
</compile_context>

<pallas_src>
import functools

import jax
import jax.numpy as jnp
from jax.experimental import pallas as pl
from jax.experimental.pallas import tpu as pltpu

SEQ = 300                 # hard-coded in the PyTorch forward
KERNEL = 5                # conv1d kernel_size == stride
T_OUT = SEQ // KERNEL     # 60 conv output positions
TP = 64                   # T_OUT padded to a sublane/vreg-aligned row count
LANE = 128                # TPU lane width


# ----------------------------- Fused kernel -----------------------------
def fused_kernel(a_ref, x_ref, w_ref, bc_ref, bf_ref, o_ref):
    """Processes BB batch element(s) per grid step.

    a_ref : (BB, K*TP, S) bf16  tap-major A_norm: row k*TP+t == A_norm row K*t+k
    x_ref : (BB, S, C)    f32   node features (cast to bf16 in-kernel)
    w_ref : (C, K*C+Vp)   bf16  [graph_w@Wc_0 | ... | graph_w@Wc_{K-1} | fc_w^T (vocab-padded)]
    bc_ref: (1, C)        f32   conv bias with graph bias folded in
    bf_ref: (1, Vp)       f32   fc bias (vocab-padded)
    o_ref : (BB, TP, Vp)  f32   sigmoid(fc); rows >= T_OUT / lanes >= vocab are padding
    """
    BB, TP_, Vp = o_ref.shape
    C = x_ref.shape[2]
    K = a_ref.shape[1] // TP_

    for i in range(BB):                              # static unroll over batch sub-block
        x_bf = x_ref[i].astype(jnp.bfloat16)         # single f32->bf16 pass, hidden under MXU

        # conv[t] = sum_k (A[5t+k] @ X) @ (graph_w @ Wc_k); tap rows are contiguous & aligned.
        conv = None
        for k in range(K):                           # static unroll over conv taps
            a_k = a_ref[i, k * TP_:(k + 1) * TP_, :]                          # (TP, S) bf16
            agg_k = jnp.dot(a_k, x_bf, preferred_element_type=jnp.float32)    # (TP, C) f32
            part = jnp.dot(agg_k.astype(jnp.bfloat16),
                           w_ref[:, k * C:(k + 1) * C],
                           preferred_element_type=jnp.float32)                # (TP, C) f32
            conv = part if conv is None else conv + part

        conv = jnp.maximum(conv + bc_ref[...], 0.0)                           # folded bias + ReLU

        fc = jnp.dot(conv.astype(jnp.bfloat16), w_ref[:, K * C:],
                     preferred_element_type=jnp.float32) + bf_ref[...]        # (TP, Vp)
        o_ref[i] = jax.nn.sigmoid(fc)                                         # lane-dense store


def fused_forward(a_tm_bf16, x_f32, kp, *, batch_block=None):
    B, S, C = x_f32.shape
    KTP = a_tm_bf16.shape[1]
    Wcols = kp["w_all"].shape[1]
    Vp = kp["bf"].shape[1]

    if batch_block is None:
        # Keep >=2 grid steps (both v7x TensorCores busy); 2 elems/step amortizes the
        # ~0.35us per-step overhead on single-core v5e/v6e once the batch is large enough.
        batch_block = 2 if (B % 2 == 0 and B >= 4) else 1
    assert B % batch_block == 0, (B, batch_block)
    grid = (B // batch_block,)

    return pl.pallas_call(
        fused_kernel,
        out_shape=jax.ShapeDtypeStruct((B, TP, Vp), jnp.float32),
        grid_spec=pltpu.PrefetchScalarGridSpec(
            num_scalar_prefetch=0,
            grid=grid,
            in_specs=[
                pl.BlockSpec((batch_block, KTP, S), lambda b: (b, 0, 0)),  # A (tap-major, bf16)
                pl.BlockSpec((batch_block, S, C), lambda b: (b, 0, 0)),    # X (f32)
                pl.BlockSpec((C, Wcols), lambda b: (0, 0)),                # packed weights
                pl.BlockSpec((1, C), lambda b: (0, 0)),                    # folded conv bias
                pl.BlockSpec((1, Vp), lambda b: (0, 0)),                   # fc bias
            ],
            out_specs=pl.BlockSpec((batch_block, TP, Vp), lambda b: (b, 0, 0)),
        ),
        compiler_params=pltpu.CompilerParams(
            dimension_semantics=("parallel",),        # megacore over batch on v7x
        ),
    )(a_tm_bf16, x_f32, kp["w_all"], kp["bc"], kp["bf"])


# ----------------------------- Parameters -----------------------------
def init_params(key, num_features, vocab_size):
    k = jax.random.split(key, 6)
    std = 0.01
    return {
        # nn.Conv1d(C, C, kernel_size=5): weight (Cout, Cin, K), bias (Cout,)
        "conv_w": std * jax.random.normal(k[0], (num_features, num_features, KERNEL), jnp.float32),
        "conv_b": std * jax.random.normal(k[1], (num_features,), jnp.float32),
        # nn.Linear(C, vocab): weight (V, C), bias (V,)
        "fc_w": std * jax.random.normal(k[2], (vocab_size, num_features), jnp.float32),
        "fc_b": jax.random.uniform(k[3], (vocab_size,), jnp.float32, 0.0, 0.01),
        # graph parameters
        "graph_w": std * jax.random.normal(k[4], (num_features, num_features), jnp.float32),
        "graph_b": jax.random.uniform(k[5], (num_features,), jnp.float32, 0.0, 0.01),
    }


def prepare_params(params, compute_dtype=jnp.bfloat16):
    """One-time weight re-layout + algebraic folding (done in f32, then cast)."""
    C = params["graph_w"].shape[0]
    V = params["fc_w"].shape[0]
    Vp = ((V + LANE - 1) // LANE) * LANE
    # Conv taps as (K, Cin, Cout): wc[k, c, o] = conv_w[o, c, k]
    wc = jnp.transpose(params["conv_w"], (2, 1, 0))
    # Fold the graph layer into the taps (exact: no nonlinearity in between).
    wk = jnp.einsum("dc,kco->kdo", params["graph_w"], wc)            # (K, C, C)
    bc = params["conv_b"] + params["graph_b"] @ wc.sum(axis=0)       # (C,)
    wf = jnp.pad(params["fc_w"].T, ((0, 0), (0, Vp - V)))            # (C, Vp) lane-dense
    bf = jnp.pad(params["fc_b"], (0, Vp - V))                        # (Vp,)
    K = wc.shape[0]
    # One contiguous, lane-dense weight buffer -> single large prologue DMA.
    w_all = jnp.concatenate([wk[k] for k in range(K)] + [wf], axis=1)   # (C, K*C + Vp)
    return {
        "w_all": w_all.astype(compute_dtype),
        "bc": bc.reshape(1, C).astype(jnp.float32),
        "bf": bf.reshape(1, Vp).astype(jnp.float32),
    }


# ----------------------------- Forward -----------------------------
@functools.partial(jax.jit, static_argnames=("vocab_size",))
def graph_model_forward(kparams, model_input, num_frames, a_norm, *, vocab_size):
    # num_frames is only .view()-ed in the reference forward and never used in compute.
    del num_frames
    B, S, C = model_input.shape
    assert S == SEQ
    # Tap-major, sublane-aligned row permutation of A_norm, fused with the bf16 cast
    # (one XLA gather+convert op; in production fold this into A_norm's producer).
    # Row k*TP + t of a_tm is A_norm row 5t+k; rows with t >= T_OUT are padding (clamped).
    t = jnp.arange(TP)
    rows = jnp.minimum(KERNEL * t[None, :] + jnp.arange(KERNEL)[:, None], S - 1)  # (K, TP)
    a_tm = a_norm[:, rows.reshape(-1), :].astype(jnp.bfloat16)                    # (B, K*TP, S)
    out_padded = fused_forward(a_tm, model_input, kparams)                        # (B, TP, Vp)
    return out_padded[:, :S // KERNEL, :vocab_size]                               # drop padding


def reference_forward(params, model_input, a_norm):
    # Pure-JAX f32 reference mirroring the PyTorch math (unfolded weights) —
    # independently validates the folding + tap-major permutation.
    B, S, C = model_input.shape
    agg = jnp.einsum("bij,bjc->bic", a_norm, model_input)
    g = jnp.einsum("bic,cd->bid", agg, params["graph_w"]) + params["graph_b"]
    T = S // KERNEL
    xu = g.reshape(B, T, KERNEL, C)
    conv = jnp.einsum("btkc,okc->bto", xu, jnp.transpose(params["conv_w"], (0, 2, 1)))
    conv = jax.nn.relu(conv + params["conv_b"])
    fc = conv @ params["fc_w"].T + params["fc_b"]
    return jax.nn.sigmoid(fc)


if __name__ == "__main__":
    B = 2
    NUM_FEATURES = 128
    VOCAB = 64

    key = jax.random.PRNGKey(0)
    kp_key, kx, ka = jax.random.split(key, 3)

    params = init_params(kp_key, NUM_FEATURES, VOCAB)
    kparams = prepare_params(params)

    model_input = jax.random.normal(kx, (B, SEQ, NUM_FEATURES), jnp.float32)
    a_norm = jax.random.normal(ka, (B, SEQ, SEQ), jnp.float32) / SEQ
    num_frames = jnp.full((B, 1), SEQ, jnp.float32)

    out = graph_model_forward(kparams, model_input, num_frames, a_norm, vocab_size=VOCAB)
    out = jax.block_until_ready(out)
    assert out.shape == (B, SEQ // KERNEL, VOCAB), out.shape

    ref = reference_forward(params, model_input, a_norm)
    max_err = float(jnp.max(jnp.abs(out - ref)))
    # bf16 matmul operands with f32 accumulation -> loosened tolerance vs f32 reference.
    assert jnp.allclose(out, ref, atol=1e-2, rtol=1e-2), max_err

    print("KERNEL_OK")
</pallas_src>

<mosaic_0001>
module attributes {stable_mosaic.version = 11 : i64} {
  func.func @fused_kernel(%arg0: i32, %arg1: memref<1x320x300xbf16, #tpu.memory_space<vmem>>, %arg2: memref<1x300x128xf32, #tpu.memory_space<vmem>>, %arg3: memref<128x768xbf16, #tpu.memory_space<vmem>>, %arg4: memref<1x128xf32, #tpu.memory_space<vmem>>, %arg5: memref<1x128xf32, #tpu.memory_space<vmem>>, %arg6: memref<1x64x128xf32, #tpu.memory_space<vmem>>) attributes {dimension_semantics = [#tpu.dimension_semantics<parallel>], iteration_bounds = array<i64: 2>, scalar_prefetch = 0 : i64, scratch_operands = 0 : i64, tpu.core_type = #tpu.core_type<tc>, window_params = [{transform_indices = @transform_0, window_bounds = array<i64: 1, 320, 300>}, {transform_indices = @transform_1, window_bounds = array<i64: 1, 300, 128>}, {pipeline_mode = #tpu.pipeline_mode<synchronous>, transform_indices = @transform_2, window_bounds = array<i64: 128, 768>}, {pipeline_mode = #tpu.pipeline_mode<synchronous>, transform_indices = @transform_3, window_bounds = array<i64: 1, 128>}, {pipeline_mode = #tpu.pipeline_mode<synchronous>, transform_indices = @transform_4, window_bounds = array<i64: 1, 128>}, {transform_indices = @transform_5, window_bounds = array<i64: 1, 64, 128>}]} {
    %c0 = arith.constant 0 : index
    %c0_0 = arith.constant 0 : index
    %c0_1 = arith.constant 0 : index
    %0 = vector.load %arg2[%c0, %c0_0, %c0_1] : memref<1x300x128xf32, #tpu.memory_space<vmem>>, vector<1x300x128xf32>
    %1 = vector.shape_cast %0 : vector<1x300x128xf32> to vector<300x128xf32>
    %2 = arith.truncf %1 : vector<300x128xf32> to vector<300x128xbf16>
    %c0_2 = arith.constant 0 : index
    %c0_3 = arith.constant 0 : index
    %c0_4 = arith.constant 0 : index
    %3 = vector.load %arg1[%c0_2, %c0_3, %c0_4] : memref<1x320x300xbf16, #tpu.memory_space<vmem>>, vector<1x64x300xbf16>
    %4 = vector.shape_cast %3 : vector<1x64x300xbf16> to vector<64x300xbf16>
    %cst = arith.constant dense<0.000000e+00> : vector<64x128xf32>
    %5 = tpu.matmul %4, %2, %cst {dimension_numbers = #tpu.dot_dimension_numbers<[1], [0], [0], [1], [0, 0, 1, 1], [], []>} : vector<64x300xbf16>, vector<300x128xbf16>, vector<64x128xf32> -> vector<64x128xf32>
    %6 = arith.truncf %5 : vector<64x128xf32> to vector<64x128xbf16>
    %c0_5 = arith.constant 0 : index
    %c0_6 = arith.constant 0 : index
    %7 = vector.load %arg3[%c0_5, %c0_6] : memref<128x768xbf16, #tpu.memory_space<vmem>>, vector<128x128xbf16>
    %cst_7 = arith.constant dense<0.000000e+00> : vector<64x128xf32>
    %8 = tpu.matmul %6, %7, %cst_7 {dimension_numbers = #tpu.dot_dimension_numbers<[1], [0], [0], [1], [0, 0, 1, 1], [], []>} : vector<64x128xbf16>, vector<128x128xbf16>, vector<64x128xf32> -> vector<64x128xf32>
    %c0_8 = arith.constant 0 : index
    %c64 = arith.constant 64 : index
    %c0_9 = arith.constant 0 : index
    %9 = vector.load %arg1[%c0_8, %c64, %c0_9] : memref<1x320x300xbf16, #tpu.memory_space<vmem>>, vector<1x64x300xbf16>
    %10 = vector.shape_cast %9 : vector<1x64x300xbf16> to vector<64x300xbf16>
    %cst_10 = arith.constant dense<0.000000e+00> : vector<64x128xf32>
    %11 = tpu.matmul %10, %2, %cst_10 {dimension_numbers = #tpu.dot_dimension_numbers<[1], [0], [0], [1], [0, 0, 1, 1], [], []>} : vector<64x300xbf16>, vector<300x128xbf16>, vector<64x128xf32> -> vector<64x128xf32>
    %12 = arith.truncf %11 : vector<64x128xf32> to vector<64x128xbf16>
    %c0_11 = arith.constant 0 : index
    %c128 = arith.constant 128 : index
    %13 = vector.load %arg3[%c0_11, %c128] : memref<128x768xbf16, #tpu.memory_space<vmem>>, vector<128x128xbf16>
    %cst_12 = arith.constant dense<0.000000e+00> : vector<64x128xf32>
    %14 = tpu.matmul %12, %13, %cst_12 {dimension_numbers = #tpu.dot_dimension_numbers<[1], [0], [0], [1], [0, 0, 1, 1], [], []>} : vector<64x128xbf16>, vector<128x128xbf16>, vector<64x128xf32> -> vector<64x128xf32>
    %15 = arith.addf %8, %14 : vector<64x128xf32>
    %c0_13 = arith.constant 0 : index
    %c128_14 = arith.constant 128 : index
    %c0_15 = arith.constant 0 : index
    %16 = vector.load %arg1[%c0_13, %c128_14, %c0_15] : memref<1x320x300xbf16, #tpu.memory_space<vmem>>, vector<1x64x300xbf16>
    %17 = vector.shape_cast %16 : vector<1x64x300xbf16> to vector<64x300xbf16>
    %cst_16 = arith.constant dense<0.000000e+00> : vector<64x128xf32>
    %18 = tpu.matmul %17, %2, %cst_16 {dimension_numbers = #tpu.dot_dimension_numbers<[1], [0], [0], [1], [0, 0, 1, 1], [], []>} : vector<64x300xbf16>, vector<300x128xbf16>, vector<64x128xf32> -> vector<64x128xf32>
    %19 = arith.truncf %18 : vector<64x128xf32> to vector<64x128xbf16>
    %c0_17 = arith.constant 0 : index
    %c256 = arith.constant 256 : index
    %20 = vector.load %arg3[%c0_17, %c256] : memref<128x768xbf16, #tpu.memory_space<vmem>>, vector<128x128xbf16>
    %cst_18 = arith.constant dense<0.000000e+00> : vector<64x128xf32>
    %21 = tpu.matmul %19, %20, %cst_18 {dimension_numbers = #tpu.dot_dimension_numbers<[1], [0], [0], [1], [0, 0, 1, 1], [], []>} : vector<64x128xbf16>, vector<128x128xbf16>, vector<64x128xf32> -> vector<64x128xf32>
    %22 = arith.addf %15, %21 : vector<64x128xf32>
    %c0_19 = arith.constant 0 : index
    %c192 = arith.constant 192 : index
    %c0_20 = arith.constant 0 : index
    %23 = vector.load %arg1[%c0_19, %c192, %c0_20] : memref<1x320x300xbf16, #tpu.memory_space<vmem>>, vector<1x64x300xbf16>
    %24 = vector.shape_cast %23 : vector<1x64x300xbf16> to vector<64x300xbf16>
    %cst_21 = arith.constant dense<0.000000e+00> : vector<64x128xf32>
    %25 = tpu.matmul %24, %2, %cst_21 {dimension_numbers = #tpu.dot_dimension_numbers<[1], [0], [0], [1], [0, 0, 1, 1], [], []>} : vector<64x300xbf16>, vector<300x128xbf16>, vector<64x128xf32> -> vector<64x128xf32>
    %26 = arith.truncf %25 : vector<64x128xf32> to vector<64x128xbf16>
    %c0_22 = arith.constant 0 : index
    %c384 = arith.constant 384 : index
    %27 = vector.load %arg3[%c0_22, %c384] : memref<128x768xbf16, #tpu.memory_space<vmem>>, vector<128x128xbf16>
    %cst_23 = arith.constant dense<0.000000e+00> : vector<64x128xf32>
    %28 = tpu.matmul %26, %27, %cst_23 {dimension_numbers = #tpu.dot_dimension_numbers<[1], [0], [0], [1], [0, 0, 1, 1], [], []>} : vector<64x128xbf16>, vector<128x128xbf16>, vector<64x128xf32> -> vector<64x128xf32>
    %29 = arith.addf %22, %28 : vector<64x128xf32>
    %c0_24 = arith.constant 0 : index
    %c256_25 = arith.constant 256 : index
    %c0_26 = arith.constant 0 : index
    %30 = vector.load %arg1[%c0_24, %c256_25, %c0_26] : memref<1x320x300xbf16, #tpu.memory_space<vmem>>, vector<1x64x300xbf16>
    %31 = vector.shape_cast %30 : vector<1x64x300xbf16> to vector<64x300xbf16>
    %cst_27 = arith.constant dense<0.000000e+00> : vector<64x128xf32>
    %32 = tpu.matmul %31, %2, %cst_27 {dimension_numbers = #tpu.dot_dimension_numbers<[1], [0], [0], [1], [0, 0, 1, 1], [], []>} : vector<64x300xbf16>, vector<300x128xbf16>, vector<64x128xf32> -> vector<64x128xf32>
    %33 = arith.truncf %32 : vector<64x128xf32> to vector<64x128xbf16>
    %c0_28 = arith.constant 0 : index
    %c512 = arith.constant 512 : index
    %34 = vector.load %arg3[%c0_28, %c512] : memref<128x768xbf16, #tpu.memory_space<vmem>>, vector<128x128xbf16>
    %cst_29 = arith.constant dense<0.000000e+00> : vector<64x128xf32>
    %35 = tpu.matmul %33, %34, %cst_29 {dimension_numbers = #tpu.dot_dimension_numbers<[1], [0], [0], [1], [0, 0, 1, 1], [], []>} : vector<64x128xbf16>, vector<128x128xbf16>, vector<64x128xf32> -> vector<64x128xf32>
    %36 = arith.addf %29, %35 : vector<64x128xf32>
    %c0_30 = arith.constant 0 : index
    %c0_31 = arith.constant 0 : index
    %37 = vector.load %arg4[%c0_30, %c0_31] : memref<1x128xf32, #tpu.memory_space<vmem>>, vector<1x128xf32>
    %38 = vector.broadcast %37 : vector<1x128xf32> to vector<64x128xf32>
    %39 = arith.addf %36, %38 : vector<64x128xf32>
    %cst_32 = arith.constant 0.000000e+00 : f32
    %40 = vector.broadcast %cst_32 : f32 to vector<64x128xf32>
    %41 = arith.maximumf %39, %40 : vector<64x128xf32>
    %42 = arith.truncf %41 : vector<64x128xf32> to vector<64x128xbf16>
    %c0_33 = arith.constant 0 : index
    %c640 = arith.constant 640 : index
    %43 = vector.load %arg3[%c0_33, %c640] : memref<128x768xbf16, #tpu.memory_space<vmem>>, vector<128x128xbf16>
    %cst_34 = arith.constant dense<0.000000e+00> : vector<64x128xf32>
    %44 = tpu.matmul %42, %43, %cst_34 {dimension_numbers = #tpu.dot_dimension_numbers<[1], [0], [0], [1], [0, 0, 1, 1], [], []>} : vector<64x128xbf16>, vector<128x128xbf16>, vector<64x128xf32> -> vector<64x128xf32>
    %c0_35 = arith.constant 0 : index
    %c0_36 = arith.constant 0 : index
    %45 = vector.load %arg5[%c0_35, %c0_36] : memref<1x128xf32, #tpu.memory_space<vmem>>, vector<1x128xf32>
    %46 = vector.broadcast %45 : vector<1x128xf32> to vector<64x128xf32>
    %47 = arith.addf %44, %46 : vector<64x128xf32>
    %48 = arith.negf %47 : vector<64x128xf32>
    %49 = math.exp %48 : vector<64x128xf32>
    %cst_37 = arith.constant 1.000000e+00 : f32
    %50 = vector.broadcast %cst_37 : f32 to vector<64x128xf32>
    %51 = arith.addf %50, %49 : vector<64x128xf32>
    %52 = arith.divf %50, %51 : vector<64x128xf32>
    %c0_38 = arith.constant 0 : index
    %c0_39 = arith.constant 0 : index
    %c0_40 = arith.constant 0 : index
    %53 = vector.load %arg6[%c0_38, %c0_39, %c0_40] : memref<1x64x128xf32, #tpu.memory_space<vmem>>, vector<1x64x128xf32>
    %54 = vector.shape_cast %53 : vector<1x64x128xf32> to vector<64x128xf32>
    %55 = vector.shape_cast %52 : vector<64x128xf32> to vector<1x64x128xf32>
    tpu.vector_store %arg6[%c0_38, %c0_39, %c0_40], %55 {strides = array<i32>} : memref<1x64x128xf32, #tpu.memory_space<vmem>>, vector<1x64x128xf32>,
    return
  }
  func.func @transform_0(%arg0: i32) -> (i32, i32, i32) {
    %c0_i32 = arith.constant 0 : i32
    %c0_i32_0 = arith.constant 0 : i32
    %c0_i32_1 = arith.constant 0 : i32
    return %arg0, %c0_i32, %c0_i32_0 : i32, i32, i32
  }
  func.func @transform_1(%arg0: i32) -> (i32, i32, i32) {
    %c0_i32 = arith.constant 0 : i32
    %c0_i32_0 = arith.constant 0 : i32
    %c0_i32_1 = arith.constant 0 : i32
    return %arg0, %c0_i32, %c0_i32_0 : i32, i32, i32
  }
  func.func @transform_2(%arg0: i32) -> (i32, i32) {
    %c0_i32 = arith.constant 0 : i32
    %c0_i32_0 = arith.constant 0 : i32
    %c0_i32_1 = arith.constant 0 : i32
    return %c0_i32, %c0_i32_0 : i32, i32
  }
  func.func @transform_3(%arg0: i32) -> (i32, i32) {
    %c0_i32 = arith.constant 0 : i32
    %c0_i32_0 = arith.constant 0 : i32
    %c0_i32_1 = arith.constant 0 : i32
    return %c0_i32, %c0_i32_0 : i32, i32
  }
  func.func @transform_4(%arg0: i32) -> (i32, i32) {
    %c0_i32 = arith.constant 0 : i32
    %c0_i32_0 = arith.constant 0 : i32
    %c0_i32_1 = arith.constant 0 : i32
    return %c0_i32, %c0_i32_0 : i32, i32
  }
  func.func @transform_5(%arg0: i32) -> (i32, i32, i32) {
    %c0_i32 = arith.constant 0 : i32
    %c0_i32_0 = arith.constant 0 : i32
    %c0_i32_1 = arith.constant 0 : i32
    return %arg0, %c0_i32, %c0_i32_0 : i32, i32, i32
  }
}

</mosaic_0001>

<bundles_post_ra>
// kernel: graph_model_forward.1
= control target key start
LH: loop header
LB: loop body
LE: loop exit
PB: predicated region body
PF: predicated region fallthrough
CT: control target
= control target key end

     0   :  { %s3289_s18 = smov 0   ;;  %s3837_s0 = inlined_call_operand.vmem [shape: bf16[2,320,300], index: 0, kind: input, shape index: {}]   ;;  %s3838_s1 = inlined_call_operand.vmem [shape: f32[2,300,128], index: 1, kind: input, shape index: {}]   ;;  %s3839_s2 = inlined_call_operand.vmem [shape: bf16[128,768], index: 2, kind: input, shape index: {}]   ;;  %s3840_s3 = inlined_call_operand.vmem [shape: f32[1,128], index: 3, kind: input, shape index: {}]   ;;  %s3841_s4 = inlined_call_operand.vmem [shape: f32[1,128], index: 4, kind: input, shape index: {}]   ;;  %s3842_s5 = inlined_call_operand.vmem [shape: f32[2,64,128], index: 5, kind: output, shape index: {}]  }
   0x1 LB: > { %s2373_s19 = sadd.s32 4294967295, %s3257_s18   ;;  %p2377_p0 = scmp.ge.s32.totalorder %s3257_s18, 1  ;;  %s3257_s18 = sphi %s3289_s18, %s15_s18  }
   0x2   : > { %p197_p1 = scmp.lt.s32.totalorder %s3257_s18, 3 }
   0x4   : > { %p198_p2 = pnand %p2377_p0, %p197_p1 }
   0x5   : > { %p230_p3 = scmp.lt.s32.totalorder (!%p198_p2), %s2373_s19, 1  ;;  %vm379_vm0 = vcmask (!%p198_p2), 359424   ;;  %vm392_vm1 = vcmask (!%p198_p2), 1045504  }
   0x6   : > { %201 = sbr.rel (%p198_p2) target bundleno = 1315 (0x523), region = 40 }
   0xd   : > { %s3844_s19 = smov (!%p230_p3, %s2373_s19), 1 }
   0xe   : > { %s3081_s20 = smul.u32 480, %s3844_s19  ;;  %s2522_s13 = sshll.u32 %s3844_s19, 6 }
   0xf   : > { %s3082_s21 = smul.u32 304, %s3844_s19  ;;  %s244_s16 = scalar_lea.vmem %s3842_s5, %s2522_s13 }
  0x10   : > { %s3304_s24 = scalar_lea.vmem %s3837_s0, %s3081_s20 }
  0x11   : > { %s3309_s27 = scalar_lea.vmem %s3838_s1, %s3082_s21  ;;  %v3091_v0 = vld [vmem:[%s3304_s24 + $0x8] ss:$12 sps:$4 sm:$0xff]   ;;  %v3092_v37 = vld [vmem:[%s3304_s24 + $0x20] ss:$12 sps:$4 sm:$0xff]   ;;  %v3095_v43 = vld [vmem:[%s3304_s24 + $0x4] ss:$12 sps:$4 sm:$0xff]  }
  0x12   : > { %v262_v1 = vld [vmem:[%s3309_s27 + $0x80] sm:$0xff]  ;;  %v263_v2 = vld [vmem:[%s3309_s27 + $0x88] sm:$0xff]  ;;  %2836 = vmatprep.mubr.msk.bf16.mxu1 %vm379_vm0, %v3091_v0  ;;  %v264_v10 = vld [vmem:[%s3309_s27 + $0x90] sm:$0xff]  ;;  %428 = vmatprep.mubr.bf16.mxu0 %v3095_v43 }
  0x13   : > { %v246_v3 = vld [vmem:[%s3309_s27] sm:$0xff]  ;;  %v3315_v4 = vpack.c.bf16 %v263_v2, %v262_v1  ;;  %v247_v5 = vld [vmem:[%s3309_s27 + $0x8] sm:$0xff]  ;;  %v265_v11 = vld [vmem:[%s3309_s27 + $0x98] sm:$0xff] }
  0x14   : > { %v278_v6 = vld [vmem:[%s3309_s27 + $0x100] sm:$0xff]  ;;  %v279_v7 = vld [vmem:[%s3309_s27 + $0x108] sm:$0xff]  ;;  %v3321_v8 = vpack.c.bf16 %v247_v5, %v246_v3  ;;  %v248_v12 = vld [vmem:[%s3309_s27 + $0x10] sm:$0xff]  ;;  %v3329_v13 = vpack.c.bf16 %v265_v11, %v264_v10 }
  0x15   : > { %v3323_v9 = vpack.c.bf16 %v279_v7, %v278_v6  ;;  %2523 = vmatprep.subr.bf16.mxu0 %v3315_v4  ;;  %v249_v14 = vld [vmem:[%s3309_s27 + $0x18] sm:$0xff]  ;;  %v280_v15 = vld [vmem:[%s3309_s27 + $0x110] sm:$0xff]  ;;  %v266_v19 = vld [vmem:[%s3309_s27 + $0xa0] sm:$0xff] }
  0x16   : > { %v281_v16 = vld [vmem:[%s3309_s27 + $0x118] sm:$0xff]  ;;  %2524 = vmatpush3.bf16.msra.mxu0 %v3321_v8  ;;  %v3336_v17 = vpack.c.bf16 %v249_v14, %v248_v12  ;;  %v267_v20 = vld [vmem:[%s3309_s27 + $0xa8] sm:$0xff]  ;;  %v250_v21 = vld [vmem:[%s3309_s27 + $0x20] sm:$0xff] }
  0x17   : > { %2830 = vmatprep.subr.bf16.mxu1 %v3323_v9  ;;  %v3338_v18 = vpack.c.bf16 %v281_v16, %v280_v15  ;;  %2525 = vmatprep.subr.bf16.mxu0 %v3329_v13  ;;  %v3345_v22 = vpack.c.bf16 %v267_v20, %v266_v19  ;;  %v251_v23 = vld [vmem:[%s3309_s27 + $0x28] sm:$0xff]  ;;  %v282_v24 = vld [vmem:[%s3309_s27 + $0x120] sm:$0xff]  ;;  %v268_v27 = vld [vmem:[%s3309_s27 + $0xb0] sm:$0xff] }
  0x18   : > { %2831 = vmatpush3.bf16.msra.mxu1 %v3323_v9  ;;  %v283_v25 = vld [vmem:[%s3309_s27 + $0x128] sm:$0xf]  ;;  %v269_v28 = vld [vmem:[%s3309_s27 + $0xb8] sm:$0xff]  ;;  %v3356_v29 = vpack.c.bf16 %v251_v23, %v250_v21  ;;  %v252_v31 = vld [vmem:[%s3309_s27 + $0x30] sm:$0xff] }
  0x19   : > { %2832 = vmatprep.subr.bf16.mxu1 %v3338_v18  ;;  %v3351_v26 = vpack.c.bf16 %v283_v25, %v282_v24  ;;  %v3360_v30 = vpack.c.bf16 %v269_v28, %v268_v27  ;;  %v253_v32 = vld [vmem:[%s3309_s27 + $0x38] sm:$0xff]  ;;  %v270_v34 = vld [vmem:[%s3309_s27 + $0xc0] sm:$0xff]  ;;  %v271_v35 = vld [vmem:[%s3309_s27 + $0xc8] sm:$0xff] }
  0x1a   : > { %2526 = vmatpush3.bf16.msra.mxu0 %v3336_v17  ;;  %v3373_v36 = vpack.c.bf16 %v253_v32, %v252_v31  ;;  %v254_v38 = vld [vmem:[%s3309_s27 + $0x40] sm:$0xff]  ;;  %v3379_v39 = vpack.c.bf16 %v271_v35, %v270_v34  ;;  %v255_v40 = vld [vmem:[%s3309_s27 + $0x48] sm:$0xff]  ;;  %v272_v41 = vld [vmem:[%s3309_s27 + $0xd0] sm:$0xff] }
  0x1b   : > { %2527 = vmatprep.subr.bf16.mxu0 %v3345_v22  ;;  %v3368_v33 = vsel %vm392_vm1, %v3351_v26, 0  ;;  %v273_v42 = vld [vmem:[%s3309_s27 + $0xd8] sm:$0xff]  ;;  %v256_v44 = vld [vmem:[%s3309_s27 + $0x50] sm:$0xff]  ;;  %v3390_v46 = vpack.c.bf16 %v255_v40, %v254_v38  ;;  %v274_v49 = vld [vmem:[%s3309_s27 + $0xe0] sm:$0xff] }
  0x1c   : > { %2833 = vmatpush3.bf16.msra.mxu1 %v3338_v18  ;;  %v3096_v45 = vld [vmem:[%s3304_s24 + $0x38] ss:$12 sps:$4 sm:$0xff]   ;;  %v3395_v48 = vpack.c.bf16 %v273_v42, %v272_v41  ;;  %v275_v50 = vld [vmem:[%s3309_s27 + $0xe8] sm:$0xff]  ;;  %v276_v54 = vld [vmem:[%s3309_s27 + $0xf0] sm:$0xff] }
  0x1d   : > { %3076 = vmatprep.subr.msk.bf16.mxu1 %vm392_vm1, %v3351_v26  ;;  %v257_v47 = vld [vmem:[%s3309_s27 + $0x58] sm:$0xff]  ;;  %v258_v51 = vld [vmem:[%s3309_s27 + $0x60] sm:$0xff]  ;;  %v259_v52 = vld [vmem:[%s3309_s27 + $0x68] sm:$0xff]  ;;  %v3410_v56 = vpack.c.bf16 %v275_v50, %v274_v49 }
  0x1e   : > { %2528 = vmatpush3.bf16.msra.mxu0 %v3356_v29  ;;  %v3404_v53 = vpack.c.bf16 %v257_v47, %v256_v44  ;;  %v3099_v55 = vld [vmem:[%s3304_s24 + $0x50] ss:$12 sps:$4 sm:$0xff]   ;;  %v3416_v59 = vpack.c.bf16 %v259_v52, %v258_v51  ;;  %v3093_v0 = vld [vmem:[%s3304_s24] ss:$12 sps:$4 sm:$0xff]   ;;  %v3100_v2 = vld [vmem:[%s3304_s24 + $0x18] ss:$12 sps:$4 sm:$0xff]  }
  0x1f   : > { %2529 = vmatprep.subr.bf16.mxu0 %v3360_v30  ;;  %v277_v57 = vld [vmem:[%s3309_s27 + $0xf8] sm:$0xff]  ;;  %v3103_v58 = vld [vmem:[%s3304_s24 + $0x64] ss:$12 sps:$4 sm:$0xff]   ;;  %v3104_v3 = vld [vmem:[%s3304_s24 + $0x34] ss:$12 sps:$4 sm:$0xff]  }
  0x20   : > { %2835 = vmatpush3.bf16.msra.mxu1 %v3368_v33  ;;  %v260_v60 = vld [vmem:[%s3309_s27 + $0x70] sm:$0xff]  ;;  %v3422_v61 = vpack.c.bf16 %v277_v57, %v276_v54  ;;  %v261_v62 = vld [vmem:[%s3309_s27 + $0x78] sm:$0xff]  ;;  %v3101_v5 = vld [vmem:[%s3304_s24 + $0x60] ss:$12 sps:$4 sm:$0xff]  }
  0x21   : > { %2570 = vmatprep.subr.bf16.mxu1 %v3315_v4  ;;  %v3427_v63 = vpack.c.bf16 %v261_v62, %v260_v60  ;;  %v3097_v1 = vld [vmem:[%s3304_s24 + $0x1c] ss:$12 sps:$4 sm:$0xff]   ;;  %v3109_v10 = vld [vmem:[%s3304_s24 + $0x4c] ss:$12 sps:$4 sm:$0xff]   ;;  %v3113_v12 = vld [vmem:[%s3304_s24 + $0x94] ss:$12 sps:$4 sm:$0xff]  }
  0x22   : > { %2530 = vmatpush3.bf16.msra.mxu0 %v3373_v36  ;;  %v3107_v6 = vld [vmem:[%s3304_s24 + $0x7c] ss:$12 sps:$4 sm:$0xff]   ;;  %v3111_v11 = vld [vmem:[%s3304_s24 + $0x78] ss:$12 sps:$4 sm:$0xff]   ;;  %v3117_v20 = vld [vmem:[%s3304_s24 + $0x80] ss:$12 sps:$4 sm:$0xff]  }
  0x23   : > { %2837 = vmatmul.mubr.msk.bf16.vlgmr.msra.gmra.mrb[0].mxu1 %vm379_vm0, %v3092_v37  ;;  %2531 = vmatprep.subr.bf16.mxu0 %v3379_v39  ;;  %v3106_v7 = vld [vmem:[%s3304_s24 + $0x30] ss:$12 sps:$4 sm:$0xff]   ;;  %v3112_v14 = vld [vmem:[%s3304_s24 + $0x48] ss:$12 sps:$4 sm:$0xff]   ;;  %v3118_v19 = vld [vmem:[%s3304_s24 + $0xac] ss:$12 sps:$4 sm:$0xff]  }
  0x24   : > { %2571 = vmatpush3.bf16.msra.mxu1 %v3321_v8  ;;  %2840 = vmatprep.mubr.msk.bf16.mxu1 %vm379_vm0, %v3096_v45  ;;  %v3116_v15 = vld [vmem:[%s3304_s24 + $0x68] ss:$12 sps:$4 sm:$0xff]   ;;  %v3115_v16 = vld [vmem:[%s3304_s24 + $0x90] ss:$12 sps:$4 sm:$0xff]   ;;  %v3121_v21 = vld [vmem:[%s3304_s24 + $0x98] ss:$12 sps:$4 sm:$0xff]  }
  0x25   : > { %2572 = vmatprep.subr.bf16.mxu1 %v3329_v13  ;;  %v3120_v23 = vld [vmem:[%s3304_s24 + $0xa8] ss:$12 sps:$4 sm:$0xff]   ;;  %v3122_v24 = vld [vmem:[%s3304_s24 + $0xb0] ss:$12 sps:$4 sm:$0xff]   ;;  %v3127_v34 = vld [vmem:[%s3304_s24 + $0xc0] ss:$12 sps:$4 sm:$0xff]  }
  0x26   : > { %2532 = vmatpush3.bf16.msra.mxu0 %v3390_v46  ;;  %v3123_v25 = vld [vmem:[%s3839_s2 + $0x4] ss:$24 sps:$4 sm:$0xff]   ;;  %v3124_v27 = vld [vmem:[%s3839_s2 + $0x34] ss:$24 sps:$4 sm:$0xff]   ;;  %v3527_v45 = vld [vmem:[%s3839_s2] ss:$24 sps:$4 sm:$0xff]  }
  0x27   : > { %2533 = vmatprep.subr.bf16.mxu0 %v3395_v48  ;;  %v3125_v28 = vld [vmem:[%s3839_s2 + $0x64] ss:$24 sps:$4 sm:$0xff]   ;;  %v3126_v31 = vld [vmem:[%s3839_s2 + $0x94] ss:$24 sps:$4 sm:$0xff]  }
  0x28   : > { %2573 = vmatpush3.bf16.msra.mxu1 %v3336_v17  ;;  %v3129_v32 = vld [vmem:[%s3304_s24 + $0xc4] ss:$12 sps:$4 sm:$0xff]   ;;  %v3131_v37 = vld [vmem:[%s3839_s2 + $0xf4] ss:$24 sps:$4 sm:$0xff]   ;;  %v3132_v38 = vld [vmem:[%s3304_s24 + $0xdc] ss:$12 sps:$4 sm:$0xff]  }
  0x29   : > { %2574 = vmatprep.subr.bf16.mxu1 %v3345_v22  ;;  %v3130_v35 = vld [vmem:[%s3839_s2 + $0xc4] ss:$24 sps:$4 sm:$0xff]   ;;  %v3136_v42 = vld [vmem:[%s3839_s2 + $0x154] ss:$24 sps:$4 sm:$0xff]  }
  0x2a   : > { %2534 = vmatpush3.bf16.msra.mxu0 %v3404_v53  ;;  %v3134_v40 = vld [vmem:[%s3304_s24 + $0xd8] ss:$12 sps:$4 sm:$0xff]   ;;  %v3137_v43 = vld [vmem:[%s3304_s24 + $0xf4] ss:$12 sps:$4 sm:$0xff]   ;;  %v3139_v44 = vld [vmem:[%s3304_s24 + $0xf0] ss:$12 sps:$4 sm:$0xff]  }
  0x2b   : > { %2841 = vmatmul.mubr.msk.bf16.gmra.mrb[4].mxu1 %vm379_vm0, %v3099_v55  ;;  %2535 = vmatprep.subr.bf16.mxu0 %v3410_v56  ;;  %v3135_v41 = vld [vmem:[%s3839_s2 + $0x124] ss:$24 sps:$4 sm:$0xff]   ;;  %v3142_v47 = vld [vmem:[%s3304_s24 + $0x10c] ss:$12 sps:$4 sm:$0xff]   ;;  %v3144_v49 = vld [vmem:[%s3304_s24 + $0x108] ss:$12 sps:$4 sm:$0xff]  }
  0x2c   : > { %2575 = vmatpush3.bf16.msra.mxu1 %v3356_v29  ;;  %666 = vmatprep.mubr.bf16.mxu1 %v3103_v58  ;;  %v3149_v50 = vld [vmem:[%s3304_s24 + $0x124] ss:$12 sps:$4 sm:$0xff]   ;;  %v3147_v51 = vld [vmem:[%s3304_s24 + $0x120] ss:$12 sps:$4 sm:$0xff]   ;;  %v3152_v52 = vld [vmem:[%s3304_s24 + $0x13c] ss:$12 sps:$4 sm:$0xff]  }
  0x2d   : > { %2576 = vmatprep.subr.bf16.mxu1 %v3360_v30  ;;  %v3154_v54 = vld [vmem:[%s3304_s24 + $0x138] ss:$12 sps:$4 sm:$0xff]   ;;  %v3157_v55 = vld [vmem:[%s3304_s24 + $0x154] ss:$12 sps:$4 sm:$0xff]   ;;  %v3159_v57 = vld [vmem:[%s3304_s24 + $0x150] ss:$12 sps:$4 sm:$0xff]  }
  0x2e   : > { %2536 = vmatpush3.bf16.msra.mxu0 %v3416_v59  ;;  %v3160_v58 = vld [vmem:[%s3304_s24 + $0x16c] ss:$12 sps:$4 sm:$0xff]   ;;  %v3162_v60 = vld [vmem:[%s3304_s24 + $0x168] ss:$12 sps:$4 sm:$0xff]  }
  0x2f   : > { %2537 = vmatprep.subr.bf16.mxu0 %v3422_v61  ;;  %v3163_v62 = vld [vmem:[%s3304_s24 + $0x128] ss:$12 sps:$4 sm:$0xff]  }
  0x30   : > { %2577 = vmatpush3.bf16.msra.mxu1 %v3373_v36 }
  0x31   : > { %2578 = vmatprep.subr.bf16.mxu1 %v3379_v39 }
  0x32   : > { %2538 = vmatpush3.bf16.msra.mxu0 %v3427_v63 }
  0x33   : > { %2844 = vmatprep.subr.bf16.mxu0 %v3323_v9 }
  0x34   : > { %2579 = vmatpush3.bf16.msra.mxu1 %v3390_v46 }
  0x35   : > { %2580 = vmatprep.subr.bf16.mxu1 %v3395_v48  ;;  %429 = vmatmul.mubr.bf16.vlgmr.msra.gmra.mrb[0].mxu0 %v3093_v0  ;;  %v3165_v0 = vld [vmem:[%s3304_s24 + $0x140] ss:$12 sps:$4 sm:$0xff]  }
  0x36   : > { %2845 = vmatpush3.bf16.msra.mxu0 %v3323_v9  ;;  %436 = vmatprep.mubr.bf16.mxu0 %v3097_v1  ;;  %v3170_v1 = vld [vmem:[%s3304_s24 + $0x170] ss:$12 sps:$4 sm:$0xff]  }
  0x37   : > { %2846 = vmatprep.subr.bf16.mxu0 %v3338_v18 }
  0x38   : > { %2581 = vmatpush3.bf16.msra.mxu1 %v3404_v53 }
  0x39   : > { %2582 = vmatprep.subr.bf16.mxu1 %v3410_v56 }
  0x3a   : > { %2847 = vmatpush3.bf16.msra.mxu0 %v3338_v18 }
  0x3b   : > { %3077 = vmatprep.subr.msk.bf16.mxu0 %vm392_vm1, %v3351_v26 }
  0x3c   : > { %2583 = vmatpush3.bf16.msra.mxu1 %v3416_v59 }
  0x3d   : > { %2584 = vmatprep.subr.bf16.mxu1 %v3422_v61  ;;  %437 = vmatmul.mubr.bf16.gmra.mrb[4].mxu0 %v3100_v2 }
  0x3e   : > { %444 = vmatprep.mubr.bf16.mxu0 %v3104_v3  ;;  %2849 = vmatpush3.bf16.msra.mxu0 %v3368_v33 }
  0x3f   : > { %2641 = vmatprep.subr.bf16.mxu0 %v3315_v4 }
  0x40   : > { %2585 = vmatpush3.bf16.msra.mxu1 %v3427_v63 }
  0x41   : > { %2858 = vmatprep.subr.bf16.mxu1 %v3123_v25 }
  0x43   : > { %667 = vmatmul.mubr.bf16.vlgmr.msra.gmra.mrb[8].mxu1 %v3101_v5 }
  0x44   : > { %674 = vmatprep.mubr.bf16.mxu1 %v3107_v6  ;;  %2859 = vmatpush3.bf16.msra.mxu1 %v3123_v25 }
  0x45   : > { %445 = vmatmul.mubr.bf16.gmra.mrb[8].mxu0 %v3106_v7  ;;  %2860 = vmatprep.subr.bf16.mxu1 %v3124_v27 }
  0x46   : > { %452 = vmatprep.mubr.bf16.mxu0 %v3109_v10 }
  0x48   : > { %2861 = vmatpush3.bf16.msra.mxu1 %v3124_v27 }
  0x49   : > { %2862 = vmatprep.subr.bf16.mxu1 %v3125_v28 }
  0x4b   : > { %675 = vmatmul.mubr.bf16.gmra.mrb[12].mxu1 %v3111_v11 }
  0x4c   : > { %682 = vmatprep.mubr.bf16.mxu1 %v3113_v12  ;;  %2863 = vmatpush3.bf16.msra.mxu1 %v3125_v28 }
  0x4d   : > { %453 = vmatmul.mubr.bf16.gmra.mrb[12].mxu0 %v3112_v14  ;;  %2864 = vmatprep.subr.bf16.mxu1 %v3126_v31 }
  0x4e   : > { %2850 = vmatprep.mubr.msk.bf16.mxu0 %vm379_vm0, %v3116_v15 }
  0x50   : > { %2865 = vmatpush3.bf16.msra.mxu1 %v3126_v31 }
  0x51   : > { %2866 = vmatprep.subr.bf16.mxu1 %v3130_v35 }
  0x53   : > { %683 = vmatmul.mubr.bf16.gmra.mrb[16].mxu1 %v3115_v16 }
  0x54   : > { %690 = vmatprep.mubr.bf16.mxu1 %v3118_v19  ;;  %2867 = vmatpush3.bf16.msra.mxu1 %v3130_v35 }
  0x55   : > { %2851 = vmatmul.mubr.msk.bf16.vlgmr.msra.gmra.mrb[16].mxu0 %vm379_vm0, %v3117_v20  ;;  %2868 = vmatprep.subr.bf16.mxu1 %v3131_v37 }
  0x56   : > { %2854 = vmatprep.mubr.msk.bf16.mxu0 %vm379_vm0, %v3121_v21  ;;  %2642 = vmatpush3.bf16.msra.mxu0 %v3321_v8 }
  0x57   : > { %2643 = vmatprep.subr.bf16.mxu0 %v3329_v13 }
  0x58   : > { %2869 = vmatpush3.bf16.msra.mxu1 %v3131_v37 }
  0x59   : > { %2870 = vmatprep.subr.bf16.mxu1 %v3135_v41 }
  0x5a   : > { %2644 = vmatpush3.bf16.msra.mxu0 %v3336_v17 }
  0x5b   : > { %691 = vmatmul.mubr.bf16.gmra.mrb[20].mxu1 %v3120_v23  ;;  %2645 = vmatprep.subr.bf16.mxu0 %v3345_v22 }
  0x5c   : > { %2871 = vmatpush3.bf16.msra.mxu1 %v3135_v41 }
  0x5d   : > { %2855 = vmatmul.mubr.msk.bf16.gmra.mrb[20].mxu0 %vm379_vm0, %v3122_v24  ;;  %2872 = vmatprep.subr.bf16.mxu1 %v3136_v42 }
  0x5e   : > { %2646 = vmatpush3.bf16.msra.mxu0 %v3356_v29  ;;  %1130 = vmatprep.mubr.bf16.mxu0 %v3129_v32 }
  0x5f   : > { %2647 = vmatprep.subr.bf16.mxu0 %v3360_v30 }
  0x60   : > { %2873 = vmatpush3.bf16.msra.mxu1 %v3136_v42 }
  0x61   : > { %2882 = vmatprep.subr.bf16.mxu1 %v3527_v45 }
  0x62   : > { %2648 = vmatpush3.bf16.msra.mxu0 %v3373_v36 }
  0x63   : > { %2649 = vmatprep.subr.bf16.mxu0 %v3379_v39 }
  0x66   : > { %2650 = vmatpush3.bf16.msra.mxu0 %v3390_v46 }
  0x67   : > { %2651 = vmatprep.subr.bf16.mxu0 %v3395_v48 }
  0x6a   : > { %2652 = vmatpush3.bf16.msra.mxu0 %v3404_v53 }
  0x6b   : > { %2653 = vmatprep.subr.bf16.mxu0 %v3410_v56 }
  0x6e   : > { %2654 = vmatpush3.bf16.msra.mxu0 %v3416_v59 }
  0x6f   : > { %2655 = vmatprep.subr.bf16.mxu0 %v3422_v61 }
  0x72   : > { %2656 = vmatpush3.bf16.msra.mxu0 %v3427_v63 }
  0x73   : > { %2700 = vmatprep.subr.bf16.mxu0 %v3315_v4 }
  0x75   : > { %1131 = vmatmul.mubr.bf16.vlgmr.msra.gmra.mrb[24].mxu0 %v3127_v34 }
  0x76   : > { %2701 = vmatpush3.bf16.msra.mxu0 %v3321_v8  ;;  %1138 = vmatprep.mubr.bf16.mxu0 %v3132_v38 }
  0x77   : > { %2702 = vmatprep.subr.bf16.mxu0 %v3329_v13 }
  0x7a   : > { %2703 = vmatpush3.bf16.msra.mxu0 %v3336_v17 }
  0x7b   : > { %2704 = vmatprep.subr.bf16.mxu0 %v3345_v22 }
  0x7d   : > { %1139 = vmatmul.mubr.bf16.gmra.mrb[28].mxu0 %v3134_v40 }
  0x7e   : > { %2705 = vmatpush3.bf16.msra.mxu0 %v3356_v29  ;;  %1146 = vmatprep.mubr.bf16.mxu0 %v3137_v43 }
  0x7f   : > { %2706 = vmatprep.subr.bf16.mxu0 %v3360_v30 }
  0x82   : > { %2707 = vmatpush3.bf16.msra.mxu0 %v3373_v36 }
  0x83   : > { %2708 = vmatprep.subr.bf16.mxu0 %v3379_v39 }
  0x85   : > { %1147 = vmatmul.mubr.bf16.gmra.mrb[32].mxu0 %v3139_v44 }
  0x86   : > { %2709 = vmatpush3.bf16.msra.mxu0 %v3390_v46  ;;  %1154 = vmatprep.mubr.bf16.mxu0 %v3142_v47 }
  0x87   : > { %2710 = vmatprep.subr.bf16.mxu0 %v3395_v48 }
  0x8a   : > { %2711 = vmatpush3.bf16.msra.mxu0 %v3404_v53 }
  0x8b   : > { %2712 = vmatprep.subr.bf16.mxu0 %v3410_v56 }
  0x8d   : > { %1155 = vmatmul.mubr.bf16.gmra.mrb[36].mxu0 %v3144_v49 }
  0x8e   : > { %2713 = vmatpush3.bf16.msra.mxu0 %v3416_v59  ;;  %1489 = vmatprep.mubr.bf16.mxu0 %v3149_v50 }
  0x8f   : > { %2714 = vmatprep.subr.bf16.mxu0 %v3422_v61 }
  0x92   : > { %2715 = vmatpush3.bf16.msra.mxu0 %v3427_v63 }
  0x93   : > { %2944 = vmatprep.subr.bf16.mxu0 %v3323_v9 }
  0x95   : > { %1490 = vmatmul.mubr.bf16.vlgmr.msra.gmra.mrb[40].mxu0 %v3147_v51 }
  0x96   : > { %2945 = vmatpush3.bf16.msra.mxu0 %v3323_v9  ;;  %1497 = vmatprep.mubr.bf16.mxu0 %v3152_v52 }
  0x97   : > { %2946 = vmatprep.subr.bf16.mxu0 %v3338_v18 }
  0x9a   : > { %2947 = vmatpush3.bf16.msra.mxu0 %v3338_v18 }
  0x9b   : > { %3079 = vmatprep.subr.msk.bf16.mxu0 %vm392_vm1, %v3351_v26 }
  0x9d   : > { %1498 = vmatmul.mubr.bf16.gmra.mrb[44].mxu0 %v3154_v54 }
  0x9e   : > { %2949 = vmatpush3.bf16.msra.mxu0 %v3368_v33  ;;  %1505 = vmatprep.mubr.bf16.mxu0 %v3157_v55 }
  0x9f   : > { %2759 = vmatprep.subr.bf16.mxu0 %v3315_v4  ;;  %v3169_v4 = vld [vmem:[%s3304_s24 + $0x158] ss:$12 sps:$4 sm:$0xff]  }
  0xa5   : > { %1506 = vmatmul.mubr.bf16.gmra.mrb[48].mxu0 %v3159_v57 }
  0xa6   : > { %1513 = vmatprep.mubr.bf16.mxu0 %v3160_v58 }
  0xad   : > { %1514 = vmatmul.mubr.bf16.gmra.mrb[52].mxu0 %v3162_v60 }
  0xae   : > { %2950 = vmatprep.mubr.msk.bf16.mxu0 %vm379_vm0, %v3163_v62 }
  0xb5   : > { %2951 = vmatmul.mubr.msk.bf16.vlgmr.msra.gmra.mrb[56].mxu0 %vm379_vm0, %v3165_v0 }
  0xb6   : > { %2760 = vmatpush3.bf16.msra.mxu0 %v3321_v8  ;;  %2954 = vmatprep.mubr.msk.bf16.mxu0 %vm379_vm0, %v3169_v4 }
  0xb7   : > { %2761 = vmatprep.subr.bf16.mxu0 %v3329_v13 }
  0xba   : > { %2762 = vmatpush3.bf16.msra.mxu0 %v3336_v17 }
  0xbb   : > { %2763 = vmatprep.subr.bf16.mxu0 %v3345_v22 }
  0xbd   : > { %2955 = vmatmul.mubr.msk.bf16.gmra.mrb[60].mxu0 %vm379_vm0, %v3170_v1 }
  0xbe   : > { %2764 = vmatpush3.bf16.msra.mxu0 %v3356_v29 }
  0xbf   : > { %2765 = vmatprep.subr.bf16.mxu0 %v3360_v30 }
  0xc2   : > { %2766 = vmatpush3.bf16.msra.mxu0 %v3373_v36 }
  0xc3   : > { %2767 = vmatprep.subr.bf16.mxu0 %v3379_v39 }
  0xc6   : > { %2768 = vmatpush3.bf16.msra.mxu0 %v3390_v46 }
  0xc7   : > { %2769 = vmatprep.subr.bf16.mxu0 %v3395_v48 }
  0xca   : > { %2770 = vmatpush3.bf16.msra.mxu0 %v3404_v53 }
  0xcb   : > { %2771 = vmatprep.subr.bf16.mxu0 %v3410_v56 }
  0xce   : > { %2772 = vmatpush3.bf16.msra.mxu0 %v3416_v59 }
  0xcf   : > { %2773 = vmatprep.subr.bf16.mxu0 %v3422_v61 }
  0xd2   : > { %2774 = vmatpush3.bf16.msra.mxu0 %v3427_v63 }
  0xf6   : > { %v2838_v8 = vpop.f32.mrb[0].mxu1 }
  0xf7   : > { %v495_v13 = vpop.f32.mrb[1].mxu1 }
  0xf8   : > { %v2839_v17 = vpop.f32.mrb[2].mxu1 }
  0xf9   : > { %v498_v22 = vpop.f32.mrb[3].mxu1 }
  0xfe   : > { %v2842_v29 = vpop.f32.mrb[4].mxu1 }
  0xff   : > { %v511_v30 = vpop.f32.mrb[5].mxu1 }
 0x100   : > { %v2843_v36 = vpop.f32.mrb[6].mxu1 }
 0x101   : > { %v514_v39 = vpop.f32.mrb[7].mxu1 }
 0x108   : > { %v2539_v46 = vpop.f32.mrb[0].mxu0 }
 0x109   : > { %v2540_v48 = vpop.f32.mrb[1].mxu0 }
 0x10a   : > { %v2541_v2 = vadd.f32 %v2540_v48, %v2539_v46  ;;  %v2542_v3 = vpop.f32.mrb[2].mxu0 }
 0x10b   : > { %v2543_v53 = vpop.f32.mrb[3].mxu0 }
 0x10c   : > { %v3578_v5 = vadd.f32 %v2541_v2, %v495_v13  ;;  %v2544_v56 = vadd.f32 %v2543_v53, %v2542_v3 }
 0x10e   : > { %v3580_v6 = vadd.f32 %v2544_v56, %v498_v22 }
 0x110   : > { %v2545_v7 = vpop.f32.mrb[4].mxu0  ;;  %v526_v59 = vpack.c.bf16 %v3580_v6, %v3578_v5  ;;  %v3156_v5 = vld [vmem:[%s3839_s2 + $0x150] ss:$24 sps:$4 sm:$0xff]  }
 0x111   : > { %v2546_v61 = vpop.f32.mrb[5].mxu0  ;;  %v3164_v6 = vld [vmem:[%s3304_s24 + $0xc8] ss:$12 sps:$4 sm:$0xff]  }
 0x112   : > { %v2547_v10 = vadd.f32 %v2546_v61, %v2545_v7  ;;  %v2548_v63 = vpop.f32.mrb[6].mxu0 }
 0x113   : > { %v2549_v11 = vpop.f32.mrb[7].mxu0 }
 0x114   : > { %v3584_v12 = vadd.f32 %v2838_v8, %v2547_v10  ;;  %v2550_v14 = vadd.f32 %v2549_v11, %v2548_v63  ;;  %v3141_v63 = vld [vmem:[%s3839_s2 + $0x30] ss:$24 sps:$4 sm:$0xff]  }
 0x116   : > { %v2586_v15 = vpop.f32.mrb[8].mxu1  ;;  %v3586_v16 = vadd.f32 %v2839_v17, %v2550_v14 }
 0x117   : > { %v2587_v19 = vpop.f32.mrb[9].mxu1 }
 0x118   : > { %v2588_v20 = vadd.f32 %v2587_v19, %v2586_v15  ;;  %v2589_v21 = vpop.f32.mrb[10].mxu1  ;;  %v527_v23 = vpack.c.bf16 %v3586_v16, %v3584_v12  ;;  %v2551_v24 = vpop.f32.mrb[8].mxu0  ;;  %v3166_v12 = vld [vmem:[%s3304_s24 + $0xe0] ss:$12 sps:$4 sm:$0xff]   ;;  %v3167_v16 = vld [vmem:[%s3304_s24 + $0xf8] ss:$12 sps:$4 sm:$0xff]  }
 0x119   : > { %v2590_v25 = vpop.f32.mrb[11].mxu1  ;;  %v2552_v27 = vpop.f32.mrb[9].mxu0 }
 0x11a   : > { %v2591_v28 = vadd.f32 %v2590_v25, %v2589_v21  ;;  %v2553_v31 = vadd.f32 %v2552_v27, %v2551_v24  ;;  %v2554_v32 = vpop.f32.mrb[10].mxu0 }
 0x11b   : > { %v2555_v34 = vpop.f32.mrb[11].mxu0 }
 0x11c   : > { %v3590_v35 = vadd.f32 %v2553_v31, %v511_v30  ;;  %v2556_v37 = vadd.f32 %v2555_v34, %v2554_v32 }
 0x11e   : > { %v2592_v38 = vpop.f32.mrb[12].mxu1  ;;  %v3592_v40 = vadd.f32 %v2556_v37, %v514_v39  ;;  %v3146_v37 = vld [vmem:[%s3839_s2 + $0x90] ss:$24 sps:$4 sm:$0xff]  }
 0x11f   : > { %v2593_v41 = vpop.f32.mrb[13].mxu1 }
 0x120   : > { %v2594_v42 = vadd.f32 %v2593_v41, %v2592_v38  ;;  %v2595_v43 = vpop.f32.mrb[14].mxu1  ;;  %v2557_v44 = vpop.f32.mrb[12].mxu0  ;;  %v528_v49 = vpack.c.bf16 %v3592_v40, %v3590_v35  ;;  %v3151_v38 = vld [vmem:[%s3839_s2 + $0xf0] ss:$24 sps:$4 sm:$0xff]   ;;  %v3155_v41 = vld [vmem:[%s3839_s2 + $0x120] ss:$24 sps:$4 sm:$0xff]  }
 0x121   : > { %v2596_v47 = vpop.f32.mrb[15].mxu1  ;;  %v2558_v50 = vpop.f32.mrb[13].mxu0  ;;  %v3173_v35 = vld [vmem:[%s3839_s2 + $0x68] ss:$24 sps:$4 sm:$0xff]   ;;  %v3168_v40 = vld [vmem:[%s3304_s24 + $0x110] ss:$12 sps:$4 sm:$0xff]  }
 0x122   : > { %v2597_v51 = vadd.f32 %v2596_v47, %v2595_v43  ;;  %v2559_v52 = vadd.f32 %v2558_v50, %v2557_v44  ;;  %v2560_v54 = vpop.f32.mrb[14].mxu0  ;;  %v3175_v43 = vld [vmem:[%s3839_s2 + $0xc8] ss:$24 sps:$4 sm:$0xff]   ;;  %v3176_v44 = vld [vmem:[%s3839_s2 + $0xf8] ss:$24 sps:$4 sm:$0xff]  }
 0x123   : > { %v2561_v55 = vpop.f32.mrb[15].mxu0 }
 0x124   : > { %v3596_v57 = vadd.f32 %v2842_v29, %v2559_v52  ;;  %v2562_v58 = vadd.f32 %v2561_v55, %v2560_v54 }
 0x126   : > { %v2598_v60 = vpop.f32.mrb[16].mxu1  ;;  %v3598_v62 = vadd.f32 %v2843_v36, %v2562_v58 }
 0x127   : > { %v2599_v0 = vpop.f32.mrb[17].mxu1 }
 0x128   : > { %v2600_v4 = vadd.f32 %v2599_v0, %v2598_v60  ;;  %v2601_v1 = vpop.f32.mrb[18].mxu1  ;;  %v2852_v8 = vpop.f32.mrb[16].mxu0  ;;  %v529_v17 = vpack.c.bf16 %v3598_v62, %v3596_v57 }
 0x129   : > { %v2602_v13 = vpop.f32.mrb[19].mxu1  ;;  %v742_v22 = vadd.f32 %v2852_v8, %v2594_v42  ;;  %v733_v30 = vpop.f32.mrb[17].mxu0  ;;  %v3174_v42 = vld [vmem:[%s3839_s2 + $0x98] ss:$24 sps:$4 sm:$0xff]  }
 0x12a   : > { %v2603_v39 = vadd.f32 %v2602_v13, %v2601_v1  ;;  %v734_v46 = vadd.f32 %v2588_v20, %v733_v30  ;;  %v2853_v48 = vpop.f32.mrb[18].mxu0 }
 0x12b   : > { %v745_v2 = vadd.f32 %v2853_v48, %v2597_v51  ;;  %v736_v29 = vpop.f32.mrb[19].mxu0 }
 0x12c   : > { %v737_v3 = vadd.f32 %v2591_v28, %v736_v29  ;;  %v3145_v28 = vld [vmem:[%s3839_s2 + $0x60] ss:$24 sps:$4 sm:$0xff]  }
 0x12d   : > { %v765_v53 = vpack.c.bf16 %v745_v2, %v742_v22 }
 0x12e   : > { %v2604_v56 = vpop.f32.mrb[20].mxu1  ;;  %v764_v36 = vpack.c.bf16 %v737_v3, %v734_v46 }
 0x12f   : > { %v2605_v7 = vpop.f32.mrb[21].mxu1 }
 0x130   : > { %v2606_v61 = vadd.f32 %v2605_v7, %v2604_v56  ;;  %v2607_v10 = vpop.f32.mrb[22].mxu1  ;;  %v2856_v11 = vpop.f32.mrb[20].mxu0  ;;  %2874 = vmatprep.mubr.bf16.mxu1 %v764_v36 }
 0x131   : > { %v2608_v14 = vpop.f32.mrb[23].mxu1  ;;  %v749_v19 = vpop.f32.mrb[21].mxu0  ;;  %2875 = vmatmul.mubr.bf16.vlgmr.msra.gmra.mrb[24].mxu1 %v765_v53 }
 0x132   : > { %v758_v15 = vadd.f32 %v2856_v11, %v2606_v61  ;;  %v2609_v20 = vadd.f32 %v2608_v14, %v2607_v10  ;;  %v750_v21 = vadd.f32 %v2600_v4, %v749_v19  ;;  %2883 = vmatpush3.bf16.msra.mxu1 %v3527_v45  ;;  %v2857_v24 = vpop.f32.mrb[22].mxu0  ;;  %v3150_v45 = vld [vmem:[%s3839_s2 + $0xc0] ss:$24 sps:$4 sm:$0xff]  }
 0x133   : > { %v752_v27 = vpop.f32.mrb[23].mxu0  ;;  %2884 = vmatprep.subr.bf16.mxu1 %v3141_v63 }
 0x134   : > { %v761_v25 = vadd.f32 %v2857_v24, %v2609_v20  ;;  %v753_v31 = vadd.f32 %v2603_v39, %v752_v27 }
 0x136   : > { %v767_v32 = vpack.c.bf16 %v761_v25, %v758_v15  ;;  %v766_v34 = vpack.c.bf16 %v753_v31, %v750_v21  ;;  %2885 = vmatpush3.bf16.msra.mxu1 %v3141_v63 }
 0x137   : > { %2886 = vmatprep.subr.bf16.mxu1 %v3145_v28 }
 0x138   : > { %2878 = vmatprep.mubr.bf16.mxu1 %v766_v34 }
 0x139   : > { %2879 = vmatmul.mubr.bf16.gmra.mrb[28].mxu1 %v767_v32 }
 0x13a   : > { %2887 = vmatpush3.bf16.msra.mxu1 %v3145_v28  ;;  %2898 = vmatprep.mubr.bf16.mxu1 %v526_v59  ;;  %v3171_v59 = vld [vmem:[%s3839_s2 + $0x8] ss:$24 sps:$4 sm:$0xff]  }
 0x13b   : > { %2888 = vmatprep.subr.bf16.mxu1 %v3146_v37 }
 0x13e   : > { %2889 = vmatpush3.bf16.msra.mxu1 %v3146_v37 }
 0x13f   : > { %2890 = vmatprep.subr.bf16.mxu1 %v3150_v45 }
 0x142   : > { %2891 = vmatpush3.bf16.msra.mxu1 %v3150_v45 }
 0x143   : > { %2892 = vmatprep.subr.bf16.mxu1 %v3151_v38 }
 0x146   : > { %2893 = vmatpush3.bf16.msra.mxu1 %v3151_v38 }
 0x147   : > { %2894 = vmatprep.subr.bf16.mxu1 %v3155_v41 }
 0x148   : > { %v2657_v47 = vpop.f32.mrb[24].mxu0 }
 0x14a   : > { %2895 = vmatpush3.bf16.msra.mxu1 %v3155_v41 }
 0x14b   : > { %2896 = vmatprep.subr.bf16.mxu1 %v3156_v5 }
 0x14e   : > { %2897 = vmatpush3.bf16.msra.mxu1 %v3156_v5  ;;  %v3177_v5 = vld [vmem:[%s3839_s2 + $0x128] ss:$24 sps:$4 sm:$0xff]  }
 0x14f   : > { %2906 = vmatprep.subr.bf16.mxu1 %v3323_v9 }
 0x151   : > { %2899 = vmatmul.mubr.bf16.vlgmr.msra.gmra.mrb[24].mxu1 %v527_v23  ;;  %v3172_v23 = vld [vmem:[%s3839_s2 + $0x38] ss:$24 sps:$4 sm:$0xff]  }
 0x152   : > { %2902 = vmatprep.mubr.bf16.mxu1 %v528_v49  ;;  %2907 = vmatpush3.bf16.msra.mxu1 %v3323_v9  ;;  %v2658_v49 = vpop.f32.mrb[25].mxu0 }
 0x153   : > { %2908 = vmatprep.subr.bf16.mxu1 %v3338_v18  ;;  %v3666_v50 = vadd.f32 %v2658_v49, %v2657_v47  ;;  %v2660_v51 = vpop.f32.mrb[26].mxu0  ;;  %v3179_v47 = vld [vmem:[%s3839_s2 + $0xc] ss:$24 sps:$4 sm:$0xff]  }
 0x154   : > { %v2661_v52 = vpop.f32.mrb[27].mxu0 }
 0x155   : > { %v3668_v54 = vadd.f32 %v2661_v52, %v2660_v51  ;;  %v2663_v55 = vpop.f32.mrb[28].mxu0 }
 0x156   : > { %2909 = vmatpush3.bf16.msra.mxu1 %v3338_v18  ;;  %v2664_v57 = vpop.f32.mrb[29].mxu0 }
 0x157   : > { %3078 = vmatprep.subr.msk.bf16.mxu1 %vm392_vm1, %v3351_v26  ;;  %v3670_v58 = vadd.f32 %v2664_v57, %v2663_v55  ;;  %v2666_v60 = vpop.f32.mrb[30].mxu0 }
 0x158   : > { %v2667_v62 = vpop.f32.mrb[31].mxu0 }
 0x159   : > { %2903 = vmatmul.mubr.bf16.gmra.mrb[28].mxu1 %v529_v17  ;;  %v3672_v0 = vadd.f32 %v2667_v62, %v2666_v60  ;;  %v2669_v4 = vpop.f32.mrb[32].mxu0 }
 0x15a   : > { %2911 = vmatpush3.bf16.msra.mxu1 %v3368_v33  ;;  %2912 = vmatprep.mubr.msk.bf16.mxu1 %vm379_vm0, %v3164_v6  ;;  %v2670_v1 = vpop.f32.mrb[33].mxu0 }
 0x15b   : > { %2920 = vmatprep.subr.bf16.mxu1 %v3171_v59  ;;  %v3674_v8 = vadd.f32 %v2670_v1, %v2669_v4  ;;  %v2672_v13 = vpop.f32.mrb[34].mxu0 }
 0x15c   : > { %v2673_v17 = vpop.f32.mrb[35].mxu0 }
 0x15d   : > { %v3676_v22 = vadd.f32 %v2673_v17, %v2672_v13  ;;  %v3189_v17 = vld [vmem:[%s3304_s24 + $0x184] ss:$12 sps:$4 sm:$0xff]  }
 0x15e   : > { %1848 = vmatprep.mubr.bf16.mxu0 %v3189_v17  ;;  %v3210_v17 = vld [vmem:[%s3839_s2 + $0x160] ss:$24 sps:$4 sm:$0xff]  }
 0x160   : > { %v2675_v30 = vpop.f32.mrb[36].mxu0 }
 0x161   : > { %2913 = vmatmul.mubr.msk.bf16.vlgmr.msra.gmra.mrb[32].mxu1 %vm379_vm0, %v3166_v12  ;;  %v2676_v39 = vpop.f32.mrb[37].mxu0 }
 0x162   : > { %2916 = vmatprep.mubr.msk.bf16.mxu1 %vm379_vm0, %v3167_v16  ;;  %2921 = vmatpush3.bf16.msra.mxu1 %v3171_v59  ;;  %v3678_v46 = vadd.f32 %v2676_v39, %v2675_v30  ;;  %v2678_v48 = vpop.f32.mrb[38].mxu0  ;;  %v3187_v30 = vld [vmem:[%s3304_s24 + $0x180] ss:$12 sps:$4 sm:$0xff]   ;;  %v3190_v39 = vld [vmem:[%s3304_s24 + $0x19c] ss:$12 sps:$4 sm:$0xff]  }
 0x163   : > { %2922 = vmatprep.subr.bf16.mxu1 %v3172_v23  ;;  %v2679_v2 = vpop.f32.mrb[39].mxu0  ;;  %1849 = vmatmul.mubr.bf16.vlgmr.msra.gmra.mrb[64].mxu0 %v3187_v30 }
 0x164   : > { %v3680_v29 = vadd.f32 %v2679_v2, %v2678_v48  ;;  %v3192_v48 = vld [vmem:[%s3304_s24 + $0x198] ss:$12 sps:$4 sm:$0xff]   ;;  %1856 = vmatprep.mubr.bf16.mxu0 %v3190_v39  ;;  %v3193_v2 = vld [vmem:[%s3304_s24 + $0x1b4] ss:$12 sps:$4 sm:$0xff]  }
 0x166   : > { %2923 = vmatpush3.bf16.msra.mxu1 %v3172_v23 }
 0x167   : > { %2924 = vmatprep.subr.bf16.mxu1 %v3173_v35 }
 0x168   : > { %v2716_v3 = vpop.f32.mrb[40].mxu0 }
 0x169   : > { %2917 = vmatmul.mubr.msk.bf16.gmra.mrb[36].mxu1 %vm379_vm0, %v3168_v40  ;;  %v2717_v53 = vpop.f32.mrb[41].mxu0 }
 0x16a   : > { %2925 = vmatpush3.bf16.msra.mxu1 %v3173_v35  ;;  %v2718_v56 = vadd.f32 %v2717_v53, %v2716_v3  ;;  %v2719_v36 = vpop.f32.mrb[42].mxu0  ;;  %v3195_v3 = vld [vmem:[%s3304_s24 + $0x1b0] ss:$12 sps:$4 sm:$0xff]   ;;  %v3198_v53 = vld [vmem:[%s3304_s24 + $0x1cc] ss:$12 sps:$4 sm:$0xff]  }
 0x16b   : > { %2926 = vmatprep.subr.bf16.mxu1 %v3174_v42  ;;  %v2720_v7 = vpop.f32.mrb[43].mxu0  ;;  %1857 = vmatmul.mubr.bf16.gmra.mrb[68].mxu0 %v3192_v48 }
 0x16c   : > { %v2721_v61 = vadd.f32 %v2720_v7, %v2719_v36  ;;  %1864 = vmatprep.mubr.bf16.mxu0 %v3193_v2 }
 0x16e   : > { %2927 = vmatpush3.bf16.msra.mxu1 %v3174_v42  ;;  %v3178_v42 = vld [vmem:[%s3839_s2 + $0x158] ss:$24 sps:$4 sm:$0xff]  }
 0x16f   : > { %2928 = vmatprep.subr.bf16.mxu1 %v3175_v43 }
 0x170   : > { %v2722_v10 = vpop.f32.mrb[44].mxu0 }
 0x171   : > { %v2723_v63 = vpop.f32.mrb[45].mxu0 }
 0x172   : > { %2929 = vmatpush3.bf16.msra.mxu1 %v3175_v43  ;;  %v2724_v11 = vadd.f32 %v2723_v63, %v2722_v10  ;;  %v2725_v14 = vpop.f32.mrb[46].mxu0 }
 0x173   : > { %2930 = vmatprep.subr.bf16.mxu1 %v3176_v44  ;;  %v2726_v15 = vpop.f32.mrb[47].mxu0  ;;  %1865 = vmatmul.mubr.bf16.gmra.mrb[72].mxu0 %v3195_v3 }
 0x174   : > { %v2727_v19 = vadd.f32 %v2726_v15, %v2725_v14  ;;  %1872 = vmatprep.mubr.bf16.mxu0 %v3198_v53 }
 0x176   : > { %2931 = vmatpush3.bf16.msra.mxu1 %v3176_v44 }
 0x177   : > { %2932 = vmatprep.subr.bf16.mxu1 %v3177_v5 }
 0x178   : > { %v2728_v20 = vpop.f32.mrb[48].mxu0 }
 0x179   : > { %v2729_v21 = vpop.f32.mrb[49].mxu0 }
 0x17a   : > { %v2730_v24 = vadd.f32 %v2729_v21, %v2728_v20  ;;  %v2731_v25 = vpop.f32.mrb[50].mxu0  ;;  %2933 = vmatpush3.bf16.msra.mxu1 %v3177_v5  ;;  %v3180_v21 = vld [vmem:[%s3839_s2 + $0x3c] ss:$24 sps:$4 sm:$0xff]   ;;  %v3206_v5 = vld [vmem:[%s3839_s2 + $0xa0] ss:$24 sps:$4 sm:$0xff]  }
 0x17b   : > { %v2732_v27 = vpop.f32.mrb[51].mxu0  ;;  %2934 = vmatprep.subr.bf16.mxu1 %v3178_v42 }
 0x17c   : > { %v2733_v28 = vadd.f32 %v2732_v27, %v2731_v25 }
 0x17e   : > { %2935 = vmatpush3.bf16.msra.mxu1 %v3178_v42 }
 0x17f   : > { %2958 = vmatprep.subr.bf16.mxu1 %v3179_v47 }
 0x180   : > { %v2734_v31 = vpop.f32.mrb[52].mxu0 }
 0x181   : > { %v2735_v32 = vpop.f32.mrb[53].mxu0 }
 0x182   : > { %v2736_v34 = vadd.f32 %v2735_v32, %v2734_v31  ;;  %v2737_v37 = vpop.f32.mrb[54].mxu0 }
 0x183   : > { %v2738_v45 = vpop.f32.mrb[55].mxu0 }
 0x184   : > { %v2739_v38 = vadd.f32 %v2738_v45, %v2737_v37  ;;  %v3186_v37 = vld [vmem:[%s3839_s2 + $0x15c] ss:$24 sps:$4 sm:$0xff]  }
 0x185   : > { %v3196_v45 = vld [vmem:[%s3304_s24 + $0x188] ss:$12 sps:$4 sm:$0xff]  }
 0x188   : > { %v2952_v41 = vpop.f32.mrb[56].mxu0 }
 0x189   : > { %v3685_v6 = vadd.f32 %v2952_v41, %v2724_v11  ;;  %v1556_v59 = vpop.f32.mrb[57].mxu0  ;;  %v3204_v41 = vld [vmem:[%s3839_s2 + $0x40] ss:$24 sps:$4 sm:$0xff]  }
 0x18a   : > { %v2953_v12 = vpop.f32.mrb[58].mxu0  ;;  %v3687_v16 = vadd.f32 %v2718_v56, %v1556_v59  ;;  %v3200_v56 = vld [vmem:[%s3304_s24 + $0x1c8] ss:$12 sps:$4 sm:$0xff]   ;;  %v3208_v59 = vld [vmem:[%s3839_s2 + $0x100] ss:$24 sps:$4 sm:$0xff]  }
 0x18b   : > { %v1559_v23 = vpop.f32.mrb[59].mxu0  ;;  %v3689_v35 = vadd.f32 %v2953_v12, %v2727_v19  ;;  %1873 = vmatmul.mubr.bf16.gmra.mrb[76].mxu0 %v3200_v56  ;;  %v3211_v56 = vld [vmem:[%s3839_s2 + $0x14] ss:$24 sps:$4 sm:$0xff]  }
 0x18c   : > { %v3691_v40 = vadd.f32 %v2721_v61, %v1559_v23  ;;  %3020 = vmatprep.subr.bf16.mxu0 %v3211_v56 }
 0x18d   : > { %v1588_v43 = vpack.c.bf16 %v3689_v35, %v3685_v6  ;;  %v3207_v6 = vld [vmem:[%s3839_s2 + $0xd0] ss:$24 sps:$4 sm:$0xff]   ;;  %3021 = vmatpush3.bf16.msra.mxu0 %v3211_v56 }
 0x18e   : > { %v1587_v44 = vpack.c.bf16 %v3691_v40, %v3687_v16 }
 0x190   : > { %v2956_v49 = vpop.f32.mrb[60].mxu0 }
 0x191   : > { %v3703_v51 = vadd.f32 %v2956_v49, %v2736_v34  ;;  %v1572_v52 = vpop.f32.mrb[61].mxu0 }
 0x192   : > { %v3705_v55 = vadd.f32 %v2730_v24, %v1572_v52  ;;  %v2957_v57 = vpop.f32.mrb[62].mxu0 }
 0x193   : > { %v3707_v60 = vadd.f32 %v2957_v57, %v2739_v38  ;;  %v1575_v62 = vpop.f32.mrb[63].mxu0  ;;  %v3203_v38 = vld [vmem:[%s3839_s2 + $0x10] ss:$24 sps:$4 sm:$0xff]  }
 0x194   : > { %v3709_v4 = vadd.f32 %v2733_v28, %v1575_v62 }
 0x195   : > { %v1590_v1 = vpack.c.bf16 %v3707_v60, %v3703_v51 }
 0x196   : > { %v1589_v13 = vpack.c.bf16 %v3709_v4, %v3705_v55 }
 0x234   : > { %v2914_v36 = vpop.f32.mrb[32].mxu1 }
 0x235   : > { %v1206_v7 = vadd.f32 %v2914_v36, %v3670_v58  ;;  %v1197_v61 = vpop.f32.mrb[33].mxu1  ;;  %v3212_v36 = vld [vmem:[%s3839_s2 + $0x44] ss:$24 sps:$4 sm:$0xff]  }
 0x236   : > { %v1198_v10 = vadd.f32 %v3666_v50, %v1197_v61  ;;  %v2915_v63 = vpop.f32.mrb[34].mxu1  ;;  %v2775_v12 = vpop.f32.mrb[64].mxu0  ;;  %3022 = vmatprep.subr.bf16.mxu0 %v3212_v36  ;;  %v3214_v61 = vld [vmem:[%s3839_s2 + $0xa4] ss:$24 sps:$4 sm:$0xff]  }
 0x237   : > { %v1209_v11 = vadd.f32 %v2915_v63, %v3672_v0  ;;  %v1200_v14 = vpop.f32.mrb[35].mxu1  ;;  %v2776_v16 = vpop.f32.mrb[65].mxu0  ;;  %3023 = vmatpush3.bf16.msra.mxu0 %v3212_v36  ;;  %v3216_v63 = vld [vmem:[%s3839_s2 + $0x104] ss:$24 sps:$4 sm:$0xff]  }
 0x238   : > { %v1201_v15 = vadd.f32 %v3668_v54, %v1200_v14  ;;  %v3181_v54 = vld [vmem:[%s3839_s2 + $0x6c] ss:$24 sps:$4 sm:$0xff]   ;;  %v2777_v23 = vadd.f32 %v2776_v16, %v2775_v12  ;;  %v2778_v35 = vpop.f32.mrb[66].mxu0 }
 0x239   : > { %v1229_v19 = vpack.c.bf16 %v1209_v11, %v1206_v7  ;;  %v2779_v40 = vpop.f32.mrb[67].mxu0  ;;  %v3213_v7 = vld [vmem:[%s3839_s2 + $0x74] ss:$24 sps:$4 sm:$0xff]  }
 0x23a   : > { %v1228_v20 = vpack.c.bf16 %v1201_v15, %v1198_v10  ;;  %v2780_v42 = vadd.f32 %v2779_v40, %v2778_v35  ;;  %3024 = vmatprep.subr.bf16.mxu0 %v3213_v7  ;;  %v3215_v10 = vld [vmem:[%s3839_s2 + $0xd4] ss:$24 sps:$4 sm:$0xff]  }
 0x23b   : > { %3025 = vmatpush3.bf16.msra.mxu0 %v3213_v7 }
 0x23c   : > { %v2918_v24 = vpop.f32.mrb[36].mxu1  ;;  %2936 = vmatprep.mubr.bf16.mxu1 %v1228_v20  ;;  %3026 = vmatprep.subr.bf16.mxu0 %v3214_v61 }
 0x23d   : > { %v1222_v25 = vadd.f32 %v2918_v24, %v3678_v46  ;;  %v1213_v58 = vpop.f32.mrb[37].mxu1  ;;  %2937 = vmatmul.mubr.bf16.vlgmr.msra.gmra.mrb[24].mxu1 %v1229_v19  ;;  %v3183_v46 = vld [vmem:[%s3839_s2 + $0xcc] ss:$24 sps:$4 sm:$0xff]  }
 0x23e   : > { %v1214_v50 = vadd.f32 %v3674_v8, %v1213_v58  ;;  %2959 = vmatpush3.bf16.msra.mxu1 %v3179_v47  ;;  %v2919_v27 = vpop.f32.mrb[38].mxu1  ;;  %v3182_v8 = vld [vmem:[%s3839_s2 + $0x9c] ss:$24 sps:$4 sm:$0xff]  }
 0x23f   : > { %v1225_v0 = vadd.f32 %v2919_v27, %v3680_v29  ;;  %v1216_v28 = vpop.f32.mrb[39].mxu1  ;;  %2960 = vmatprep.subr.bf16.mxu1 %v3180_v21  ;;  %v3185_v29 = vld [vmem:[%s3839_s2 + $0x12c] ss:$24 sps:$4 sm:$0xff]   ;;  %3027 = vmatpush3.bf16.msra.mxu0 %v3214_v61 }
 0x240   : > { %v1217_v31 = vadd.f32 %v3676_v22, %v1216_v28  ;;  %v3184_v22 = vld [vmem:[%s3839_s2 + $0xfc] ss:$24 sps:$4 sm:$0xff]   ;;  %3028 = vmatprep.subr.bf16.mxu0 %v3215_v10 }
 0x241   : > { %v1231_v32 = vpack.c.bf16 %v1225_v0, %v1222_v25 }
 0x242   : > { %v1230_v34 = vpack.c.bf16 %v1217_v31, %v1214_v50  ;;  %2961 = vmatpush3.bf16.msra.mxu1 %v3180_v21 }
 0x243   : > { %2962 = vmatprep.subr.bf16.mxu1 %v3181_v54  ;;  %3029 = vmatpush3.bf16.msra.mxu0 %v3215_v10 }
 0x244   : > { %2940 = vmatprep.mubr.bf16.mxu1 %v1230_v34  ;;  %3030 = vmatprep.subr.bf16.mxu0 %v3216_v63 }
 0x245   : > { %2941 = vmatmul.mubr.bf16.gmra.mrb[28].mxu1 %v1231_v32 }
 0x246   : > { %2963 = vmatpush3.bf16.msra.mxu1 %v3181_v54  ;;  %2974 = vmatprep.mubr.bf16.mxu1 %v1587_v44 }
 0x247   : > { %2964 = vmatprep.subr.bf16.mxu1 %v3182_v8  ;;  %3031 = vmatpush3.bf16.msra.mxu0 %v3216_v63 }
 0x24a   : > { %2965 = vmatpush3.bf16.msra.mxu1 %v3182_v8 }
 0x24b   : > { %2966 = vmatprep.subr.bf16.mxu1 %v3183_v46 }
 0x24e   : > { %2967 = vmatpush3.bf16.msra.mxu1 %v3183_v46 }
 0x24f   : > { %2968 = vmatprep.subr.bf16.mxu1 %v3184_v22 }
 0x252   : > { %2969 = vmatpush3.bf16.msra.mxu1 %v3184_v22 }
 0x253   : > { %2970 = vmatprep.subr.bf16.mxu1 %v3185_v29 }
 0x256   : > { %2971 = vmatpush3.bf16.msra.mxu1 %v3185_v29  ;;  %v3217_v29 = vld [vmem:[%s3839_s2 + $0x134] ss:$24 sps:$4 sm:$0xff]  }
 0x257   : > { %2972 = vmatprep.subr.bf16.mxu1 %v3186_v37  ;;  %3032 = vmatprep.subr.bf16.mxu0 %v3217_v29 }
 0x258   : > { %3033 = vmatpush3.bf16.msra.mxu0 %v3217_v29 }
 0x25a   : > { %2973 = vmatpush3.bf16.msra.mxu1 %v3186_v37  ;;  %v3218_v37 = vld [vmem:[%s3839_s2 + $0x164] ss:$24 sps:$4 sm:$0xff]  }
 0x25b   : > { %2982 = vmatprep.subr.bf16.mxu1 %v3323_v9  ;;  %3034 = vmatprep.subr.bf16.mxu0 %v3218_v37 }
 0x25c   : > { %3035 = vmatpush3.bf16.msra.mxu0 %v3218_v37 }
 0x25d   : > { %2975 = vmatmul.mubr.bf16.vlgmr.msra.gmra.mrb[24].mxu1 %v1588_v43  ;;  %v2781_v43 = vpop.f32.mrb[68].mxu0 }
 0x25e   : > { %2978 = vmatprep.mubr.bf16.mxu1 %v1589_v13  ;;  %2983 = vmatpush3.bf16.msra.mxu1 %v3323_v9  ;;  %v3197_v9 = vld [vmem:[%s3304_s24 + $0x1a0] ss:$12 sps:$4 sm:$0xff]   ;;  %v2782_v44 = vpop.f32.mrb[69].mxu0 }
 0x25f   : > { %2984 = vmatprep.subr.bf16.mxu1 %v3338_v18  ;;  %v2783_v47 = vadd.f32 %v2782_v44, %v2781_v43  ;;  %v2784_v49 = vpop.f32.mrb[70].mxu0 }
 0x260   : > { %v2785_v51 = vpop.f32.mrb[71].mxu0 }
 0x261   : > { %v2786_v52 = vadd.f32 %v2785_v51, %v2784_v49  ;;  %v2787_v55 = vpop.f32.mrb[72].mxu0 }
 0x262   : > { %2985 = vmatpush3.bf16.msra.mxu1 %v3338_v18  ;;  %v3201_v18 = vld [vmem:[%s3304_s24 + $0x1b8] ss:$12 sps:$4 sm:$0xff]   ;;  %v2788_v57 = vpop.f32.mrb[73].mxu0 }
 0x263   : > { %3080 = vmatprep.subr.msk.bf16.mxu1 %vm392_vm1, %v3351_v26  ;;  %v3205_v26 = vld [vmem:[%s3839_s2 + $0x70] ss:$24 sps:$4 sm:$0xff]   ;;  %v2789_v60 = vadd.f32 %v2788_v57, %v2787_v55  ;;  %v2790_v62 = vpop.f32.mrb[74].mxu0 }
 0x264   : > { %v2791_v4 = vpop.f32.mrb[75].mxu0 }
 0x265   : > { %2979 = vmatmul.mubr.bf16.gmra.mrb[28].mxu1 %v1590_v1  ;;  %v3209_v1 = vld [vmem:[%s3839_s2 + $0x130] ss:$24 sps:$4 sm:$0xff]   ;;  %v2792_v13 = vadd.f32 %v2791_v4, %v2790_v62  ;;  %v2793_v30 = vpop.f32.mrb[76].mxu0 }
 0x266   : > { %2987 = vmatpush3.bf16.msra.mxu1 %v3368_v33  ;;  %2988 = vmatprep.mubr.msk.bf16.mxu1 %vm379_vm0, %v3196_v45  ;;  %v3202_v33 = vld [vmem:[%s3304_s24 + $0x1d0] ss:$12 sps:$4 sm:$0xff]   ;;  %v2794_v39 = vpop.f32.mrb[77].mxu0  ;;  %v2502_v45 = vld [vmem:[%s3840_s3] ss:$0 sm:$0xff] }
 0x267   : > { %2996 = vmatprep.subr.bf16.mxu1 %v3203_v38  ;;  %v2795_v48 = vadd.f32 %v2794_v39, %v2793_v30  ;;  %v2796_v2 = vpop.f32.mrb[78].mxu0 }
 0x268   : > { %v2797_v3 = vpop.f32.mrb[79].mxu0 }
 0x269   : > { %v2798_v53 = vadd.f32 %v2797_v3, %v2796_v2 }
 0x26d   : > { %2989 = vmatmul.mubr.msk.bf16.vlgmr.msra.gmra.mrb[40].mxu1 %vm379_vm0, %v3197_v9 }
 0x26e   : > { %2992 = vmatprep.mubr.msk.bf16.mxu1 %vm379_vm0, %v3201_v18  ;;  %2997 = vmatpush3.bf16.msra.mxu1 %v3203_v38 }
 0x26f   : > { %2998 = vmatprep.subr.bf16.mxu1 %v3204_v41 }
 0x272   : > { %2999 = vmatpush3.bf16.msra.mxu1 %v3204_v41 }
 0x273   : > { %3000 = vmatprep.subr.bf16.mxu1 %v3205_v26 }
 0x275   : > { %2993 = vmatmul.mubr.msk.bf16.gmra.mrb[44].mxu1 %vm379_vm0, %v3202_v33 }
 0x276   : > { %3001 = vmatpush3.bf16.msra.mxu1 %v3205_v26 }
 0x277   : > { %3002 = vmatprep.subr.bf16.mxu1 %v3206_v5 }
 0x27a   : > { %3003 = vmatpush3.bf16.msra.mxu1 %v3206_v5 }
 0x27b   : > { %3004 = vmatprep.subr.bf16.mxu1 %v3207_v6 }
 0x27e   : > { %3005 = vmatpush3.bf16.msra.mxu1 %v3207_v6 }
 0x27f   : > { %3006 = vmatprep.subr.bf16.mxu1 %v3208_v59 }
 0x282   : > { %3007 = vmatpush3.bf16.msra.mxu1 %v3208_v59 }
 0x283   : > { %3008 = vmatprep.subr.bf16.mxu1 %v3209_v1 }
 0x286   : > { %3009 = vmatpush3.bf16.msra.mxu1 %v3209_v1 }
 0x287   : > { %3010 = vmatprep.subr.bf16.mxu1 %v3210_v17 }
 0x28a   : > { %3011 = vmatpush3.bf16.msra.mxu1 %v3210_v17  ;;  %v2503_v17 = vld [vmem:[%s3841_s4] ss:$0 sm:$0xff] }
 0x340   : > { %v2990_v11 = vpop.f32.mrb[40].mxu1 }
 0x341   : > { %v1924_v14 = vadd.f32 %v2990_v11, %v2783_v47  ;;  %v1915_v15 = vpop.f32.mrb[41].mxu1 }
 0x342   : > { %v1916_v19 = vadd.f32 %v2777_v23, %v1915_v15  ;;  %v2991_v20 = vpop.f32.mrb[42].mxu1 }
 0x343   : > { %v1927_v21 = vadd.f32 %v2991_v20, %v2786_v52  ;;  %v1918_v24 = vpop.f32.mrb[43].mxu1 }
 0x344   : > { %v1919_v25 = vadd.f32 %v2780_v42, %v1918_v24 }
 0x345   : > { %v1947_v58 = vpack.c.bf16 %v1927_v21, %v1924_v14 }
 0x346   : > { %v1946_v50 = vpack.c.bf16 %v1919_v25, %v1916_v19 }
 0x348   : > { %v2994_v27 = vpop.f32.mrb[44].mxu1  ;;  %3012 = vmatprep.mubr.bf16.mxu1 %v1946_v50 }
 0x349   : > { %v1940_v0 = vadd.f32 %v2994_v27, %v2795_v48  ;;  %v1931_v28 = vpop.f32.mrb[45].mxu1  ;;  %3013 = vmatmul.mubr.bf16.vlgmr.msra.gmra.mrb[24].mxu1 %v1947_v58 }
 0x34a   : > { %v1932_v54 = vadd.f32 %v2789_v60, %v1931_v28  ;;  %v2995_v31 = vpop.f32.mrb[46].mxu1 }
 0x34b   : > { %v1943_v32 = vadd.f32 %v2995_v31, %v2798_v53  ;;  %v1934_v34 = vpop.f32.mrb[47].mxu1 }
 0x34c   : > { %v1935_v8 = vadd.f32 %v2792_v13, %v1934_v34 }
 0x34d   : > { %v1949_v46 = vpack.c.bf16 %v1943_v32, %v1940_v0 }
 0x34e   : > { %v1948_v22 = vpack.c.bf16 %v1935_v8, %v1932_v54 }
 0x350   : > { %3016 = vmatprep.mubr.bf16.mxu1 %v1948_v22 }
 0x351   : > { %3017 = vmatmul.mubr.bf16.gmra.mrb[28].mxu1 %v1949_v46 }
 0x41c   : > { %v3014_v38 = vpop.f32.mrb[24].mxu1 }
 0x41d   : > { %v2096_v9 = vadd.f32 %v3014_v38, %v2502_v45  ;;  %v2048_v18 = vpop.f32.mrb[25].mxu1 }
 0x41e   : > { %v2094_v41 = vadd.f32 %v2502_v45, %v2048_v18  ;;  %v3015_v26 = vpop.f32.mrb[26].mxu1 }
 0x41f   : > { %v2097_v33 = vadd.f32 %v3015_v26, %v2502_v45  ;;  %v2051_v5 = vpop.f32.mrb[27].mxu1  ;;  %v2104_v59 = vmax.f32 %v2096_v9, 0.0 }
 0x420   : > { %v2095_v6 = vadd.f32 %v2502_v45, %v2051_v5  ;;  %v2102_v16 = vmax.f32 %v2094_v41, 0.0 }
 0x421   : > { %v2105_v12 = vmax.f32 %v2097_v33, 0.0 }
 0x422   : > { %v2103_v23 = vmax.f32 %v2095_v6, 0.0 }
 0x423   : > { %v2111_v35 = vpack.c.bf16 %v2105_v12, %v2104_v59 }
 0x424   : > { %v2110_v40 = vpack.c.bf16 %v2103_v23, %v2102_v16  ;;  %v3018_v42 = vpop.f32.mrb[28].mxu1 }
 0x425   : > { %v2100_v43 = vadd.f32 %v3018_v42, %v2502_v45  ;;  %v2064_v44 = vpop.f32.mrb[29].mxu1 }
 0x426   : > { %v2098_v47 = vadd.f32 %v2502_v45, %v2064_v44  ;;  %v3019_v49 = vpop.f32.mrb[30].mxu1  ;;  %3036 = vmatprep.mubr.bf16.mxu0 %v2110_v40 }
 0x427   : > { %v2101_v51 = vadd.f32 %v3019_v49, %v2502_v45  ;;  %v2067_v52 = vpop.f32.mrb[31].mxu1  ;;  %3037 = vmatmul.mubr.bf16.vlgmr.msra.gmra.mrb[80].mxu0 %v2111_v35  ;;  %v2108_v57 = vmax.f32 %v2100_v43, 0.0 }
 0x428   : > { %v2099_v55 = vadd.f32 %v2502_v45, %v2067_v52  ;;  %v2106_v62 = vmax.f32 %v2098_v47, 0.0 }
 0x429   : > { %v2109_v60 = vmax.f32 %v2101_v51, 0.0 }
 0x42a   : > { %v2107_v4 = vmax.f32 %v2099_v55, 0.0 }
 0x42b   : > { %v2113_v1 = vpack.c.bf16 %v2109_v60, %v2108_v57 }
 0x42c   : > { %v2112_v13 = vpack.c.bf16 %v2107_v4, %v2106_v62 }
 0x42e   : > { %3040 = vmatprep.mubr.bf16.mxu0 %v2112_v13 }
 0x42f   : > { %3041 = vmatmul.mubr.bf16.gmra.mrb[84].mxu0 %v2113_v1 }
 0x4fa   : > { %v3038_v30 = vpop.f32.mrb[80].mxu0 }
 0x4fb   : > { %v2228_v39 = vadd.f32 %v3038_v30, %v2503_v17  ;;  %v2219_v48 = vpop.f32.mrb[81].mxu0 }
 0x4fc   : > { %v2220_v2 = vadd.f32 %v2503_v17, %v2219_v48  ;;  %v3039_v3 = vpop.f32.mrb[82].mxu0 }
 0x4fd   : > { %v2514_v53 = vmul.f32 -1.442695, %v2228_v39  ;;  %v2231_v56 = vadd.f32 %v3039_v3, %v2503_v17  ;;  %v2222_v36 = vpop.f32.mrb[83].mxu0 }
 0x4fe   : > { %v2512_v7 = vmul.f32 -1.442695, %v2220_v2  ;;  %v2223_v61 = vadd.f32 %v2503_v17, %v2222_v36 }
 0x4ff   : > { %3219 = vpow2.f32 %v2514_v53  ;;  %v2515_v10 = vmul.f32 -1.442695, %v2231_v56 }
 0x500   : > { %3221 = vpow2.f32 %v2512_v7  ;;  %v2513_v63 = vmul.f32 -1.442695, %v2223_v61 }
 0x501   : > { %3223 = vpow2.f32 %v2515_v10 }
 0x502   : > { %3225 = vpow2.f32 %v2513_v63  ;;  %v3042_v11 = vpop.f32.mrb[84].mxu0 }
 0x503   : > { %v2244_v14 = vadd.f32 %v3042_v11, %v2503_v17  ;;  %v2235_v15 = vpop.f32.mrb[85].mxu0 }
 0x504   : > { %v2236_v19 = vadd.f32 %v2503_v17, %v2235_v15  ;;  %v3043_v20 = vpop.f32.mrb[86].mxu0 }
 0x505   : > { %v2518_v21 = vmul.f32 -1.442695, %v2244_v14  ;;  %v2247_v24 = vadd.f32 %v3043_v20, %v2503_v17  ;;  %v2238_v25 = vpop.f32.mrb[87].mxu0 }
 0x506   : > { %v2516_v58 = vmul.f32 -1.442695, %v2236_v19  ;;  %v2239_v50 = vadd.f32 %v2503_v17, %v2238_v25 }
 0x507   : > { %3227 = vpow2.f32 %v2518_v21  ;;  %v2519_v27 = vmul.f32 -1.442695, %v2247_v24 }
 0x508   : > { %3229 = vpow2.f32 %v2516_v58  ;;  %v2517_v0 = vmul.f32 -1.442695, %v2239_v50 }
 0x509   : > { %v3220_v28 = vpop.eup %3219  ;;  %3231 = vpow2.f32 %v2519_v27 }
 0x50a   : > { %v3222_v54 = vpop.eup %3221  ;;  %v2276_v31 = vadd.f32 1.0, %v3220_v28  ;;  %3233 = vpow2.f32 %v2517_v0 }
 0x50b   : > { %v3224_v32 = vpop.eup %3223  ;;  %v2274_v34 = vadd.f32 1.0, %v3222_v54 }
 0x50c   : > { %v3226_v8 = vpop.eup %3225  ;;  %3235 = vrcp.f32 %v2276_v31  ;;  %v2277_v46 = vadd.f32 1.0, %v3224_v32 }
 0x50d   : > { %3237 = vrcp.f32 %v2274_v34  ;;  %v2275_v22 = vadd.f32 1.0, %v3226_v8 }
 0x50e   : > { %3239 = vrcp.f32 %v2277_v46 }
 0x50f   : > { %3241 = vrcp.f32 %v2275_v22 }
 0x511   : > { %v3228_v29 = vpop.eup %3227 }
 0x512   : > { %v3230_v37 = vpop.eup %3229  ;;  %v2280_v45 = vadd.f32 1.0, %v3228_v29 }
 0x513   : > { %v3232_v38 = vpop.eup %3231  ;;  %v2278_v9 = vadd.f32 1.0, %v3230_v37 }
 0x514   : > { %v3234_v18 = vpop.eup %3233  ;;  %3243 = vrcp.f32 %v2280_v45  ;;  %v2281_v41 = vadd.f32 1.0, %v3232_v38 }
 0x515   : > { %3245 = vrcp.f32 %v2278_v9  ;;  %v2279_v26 = vadd.f32 1.0, %v3234_v18 }
 0x516   : > { %v3236_v33 = vpop.eup %3235  ;;  %3247 = vrcp.f32 %v2281_v41 }
 0x517   : > { %v3238_v5 = vpop.eup %3237  ;;  %2300 = vst [vmem:[%s244_s16 + $0x10] sm:$0xff] %v3236_v33  ;;  %3249 = vrcp.f32 %v2279_v26 }
 0x518   : > { %v3240_v6 = vpop.eup %3239  ;;  %2298 = vst [vmem:[%s244_s16] sm:$0xff] %v3238_v5 }
 0x519   : > { %v3242_v59 = vpop.eup %3241  ;;  %2301 = vst [vmem:[%s244_s16 + $0x18] sm:$0xff] %v3240_v6 }
 0x51a   : > { %2299 = vst [vmem:[%s244_s16 + $0x8] sm:$0xff] %v3242_v59 }
 0x51e   : > { %v3244_v12 = vpop.eup %3243 }
 0x51f   : > { %v3246_v16 = vpop.eup %3245  ;;  %2304 = vst [vmem:[%s244_s16 + $0x30] sm:$0xff] %v3244_v12 }
 0x520   : > { %v3248_v23 = vpop.eup %3247  ;;  %2302 = vst [vmem:[%s244_s16 + $0x20] sm:$0xff] %v3246_v16 }
 0x521   : > { %v3250_v35 = vpop.eup %3249  ;;  %2305 = vst [vmem:[%s244_s16 + $0x38] sm:$0xff] %v3248_v23 }
 0x522   : > { %2303 = vst [vmem:[%s244_s16 + $0x28] sm:$0xff] %v3250_v35 }
 0x523 PF: > { %s15_s18 = sadd.s32 1, %s3257_s18  }
 0x524   : > { %p12_p4 = scmp.ge.s32.totalorder %s15_s18, 4  }
 0x526   :  { %14 = sbr.rel (!%p12_p4) target bundleno = 1 (0x1), region = 73 }

</bundles_post_ra>
